<compile_context>
chip_gen: v5e
topology: v5e:2x2
jax: 0.10.0
libtpu: 0.0.40
codegen_flags: <defaults>
</compile_context>

<pallas_src>
import functools

import jax
import jax.numpy as jnp
from jax.experimental import pallas as pl
from jax.experimental.pallas import tpu as pltpu

LANE = 128
_FUSED_MAX_NPAD = 1024            # whole-network single-kernel path threshold
_RESIDENT_X_MAX_BYTES = 8 << 20   # keep the [N, d] operand resident below this


def _round_up(x, m):
    return (x + m - 1) // m * m


# --------------------------- tiled kernels ----------------------------------
def _prop_kernel(a_ref, x_ref, s_ref, o_ref, acc_ref, *, tk, resident):
    """Y = s_row * (B @ X); B is exact 0/1 int8, cast to bf16 in-kernel."""
    k = pl.program_id(1)

    @pl.when(k == 0)
    def _():
        acc_ref[...] = jnp.zeros_like(acc_ref)

    a = a_ref[...].astype(jnp.bfloat16)
    if resident:
        xb = x_ref[pl.ds(pl.multiple_of(k * tk, tk), tk), :]
    else:
        xb = x_ref[...]
    acc_ref[...] += jnp.dot(a, xb, preferred_element_type=jnp.float32)

    @pl.when(k == pl.num_programs(1) - 1)
    def _():
        o_ref[...] = (s_ref[...] * acc_ref[...]).astype(o_ref.dtype)


def _prop_lin_relu_kernel(a_ref, x_ref, s_ref, w_ref, b_ref, o_ref, acc_ref,
                          *, tk, resident):
    """Y = s_row * relu((s_row * (B @ X)) @ W + b).

    The trailing s_row (= D^{-1/2}) pre-scales the result for the next conv's
    propagation, so the next kernel can consume it directly.
    """
    k = pl.program_id(1)

    @pl.when(k == 0)
    def _():
        acc_ref[...] = jnp.zeros_like(acc_ref)

    a = a_ref[...].astype(jnp.bfloat16)
    if resident:
        xb = x_ref[pl.ds(pl.multiple_of(k * tk, tk), tk), :]
    else:
        xb = x_ref[...]
    acc_ref[...] += jnp.dot(a, xb, preferred_element_type=jnp.float32)

    @pl.when(k == pl.num_programs(1) - 1)
    def _():
        s = s_ref[...]
        pre = (s * acc_ref[...]).astype(w_ref.dtype)
        z = jnp.dot(pre, w_ref[...], preferred_element_type=jnp.float32) + b_ref[...]
        # F.dropout(training=self.training) is an inference no-op.
        # TODO(synk): training-mode dropout (PRNG mask + 1/(1-p) scale) not emitted.
        o_ref[...] = (s * jnp.maximum(z, 0.0)).astype(o_ref.dtype)


def _prop_lin_logsoftmax_kernel(a_ref, x_ref, s_ref, w_ref, b_ref, o_ref,
                                acc_ref, *, tk, resident):
    """Y = log_softmax((s_row * (B @ X)) @ W + b, axis=-1).

    Padded class lanes carry a -1e30 bias so they vanish from the softmax.
    """
    k = pl.program_id(1)

    @pl.when(k == 0)
    def _():
        acc_ref[...] = jnp.zeros_like(acc_ref)

    a = a_ref[...].astype(jnp.bfloat16)
    if resident:
        xb = x_ref[pl.ds(pl.multiple_of(k * tk, tk), tk), :]
    else:
        xb = x_ref[...]
    acc_ref[...] += jnp.dot(a, xb, preferred_element_type=jnp.float32)

    @pl.when(k == pl.num_programs(1) - 1)
    def _():
        pre = (s_ref[...] * acc_ref[...]).astype(w_ref.dtype)
        z = jnp.dot(pre, w_ref[...], preferred_element_type=jnp.float32) + b_ref[...]
        m = jnp.max(z, axis=-1, keepdims=True)
        ssum = jnp.sum(jnp.exp(z - m), axis=-1, keepdims=True)
        o_ref[...] = (z - m - jnp.log(ssum)).astype(o_ref.dtype)


# --------------------------- fused small-graph kernel -----------------------
def _fused_kernel(a_ref, xs_ref, dinv_ref, dinvsq_ref, w1_ref, b1_ref,
                  w2_ref, b2_ref, o_ref):
    """Whole SGCNet forward with A resident in VMEM (read from HBM once)."""
    a = a_ref[...].astype(jnp.bfloat16)            # exact 0/1 -> lossless cast
    dinv = dinv_ref[...]
    dinvsq = dinvsq_ref[...]
    # conv1, K=2:  Ahat^2 X == dinv * B @ (dinvsq * (B @ (dinv * X)))
    t = jnp.dot(a, xs_ref[...], preferred_element_type=jnp.float32) * dinvsq
    t = jnp.dot(a, t.astype(jnp.bfloat16), preferred_element_type=jnp.float32) * dinv
    z = jnp.dot(t.astype(jnp.bfloat16), w1_ref[...],
                preferred_element_type=jnp.float32) + b1_ref[...]
    # ReLU; dropout(training=False) is a no-op; pre-scale by dinv for conv2.
    h = dinv * jnp.maximum(z, 0.0)
    # conv2, K=2
    t = jnp.dot(a, h.astype(jnp.bfloat16), preferred_element_type=jnp.float32) * dinvsq
    t = jnp.dot(a, t.astype(jnp.bfloat16), preferred_element_type=jnp.float32) * dinv
    z = jnp.dot(t.astype(jnp.bfloat16), w2_ref[...],
                preferred_element_type=jnp.float32) + b2_ref[...]
    m = jnp.max(z, axis=-1, keepdims=True)
    ssum = jnp.sum(jnp.exp(z - m), axis=-1, keepdims=True)
    o_ref[...] = (z - m - jnp.log(ssum)).astype(o_ref.dtype)


# --------------------------- pallas_call wrappers ---------------------------
def _vmem_limit(n_pad, d_in, d_out, tm, tk, resident, out_itemsize):
    a_bufs = 2 * tm * tk                                   # int8 A, double-buffered
    x_bufs = n_pad * d_in * 2 if resident else 2 * tk * d_in * 2
    o_bufs = 2 * tm * d_out * out_itemsize
    acc = tm * d_in * 4
    small = d_in * d_out * 2 + 2 * d_out * 4 + 2 * tm * 4  # W, b, row scales
    total = a_bufs + x_bufs + o_bufs + acc + small
    # 2x headroom (in-kernel int8->bf16 A tile + compiler scratch); clamp below
    # v7x's 64 MiB physical VMEM.
    return int(min(max(2 * total + (4 << 20), 16 << 20), 48 << 20))


def _tiled_propagate(a_i8, xs, scale, *, tm, tk):
    n_pad, d = a_i8.shape[0], xs.shape[1]
    grid = (n_pad // tm, n_pad // tk)
    resident = n_pad * d * 2 <= _RESIDENT_X_MAX_BYTES
    x_spec = (pl.BlockSpec((n_pad, d), lambda i, k: (0, 0)) if resident
              else pl.BlockSpec((tk, d), lambda i, k: (k, 0)))
    vmem = _vmem_limit(n_pad, d, d, tm, tk, resident, 2)
    kernel = functools.partial(_prop_kernel, tk=tk, resident=resident)
    return pl.pallas_call(
        kernel,
        out_shape=jax.ShapeDtypeStruct((n_pad, d), jnp.bfloat16),
        grid_spec=pltpu.PrefetchScalarGridSpec(
            num_scalar_prefetch=0,
            grid=grid,
            in_specs=[
                pl.BlockSpec((tm, tk), lambda i, k: (i, k)),
                x_spec,
                pl.BlockSpec((tm, 1), lambda i, k: (i, 0)),
            ],
            out_specs=pl.BlockSpec((tm, d), lambda i, k: (i, 0)),
            scratch_shapes=[pltpu.VMEM((tm, d), jnp.float32)],
        ),
        compiler_params=pltpu.CompilerParams(
            dimension_semantics=("parallel", "arbitrary"),
            vmem_limit_bytes=vmem),
    )(a_i8, xs, scale)


def _tiled_propagate_lin(a_i8, xs, scale, w, b, *, kernel_fn, out_dtype, tm, tk):
    n_pad, d_in = a_i8.shape[0], xs.shape[1]
    d_out = w.shape[1]
    grid = (n_pad // tm, n_pad // tk)
    resident = n_pad * d_in * 2 <= _RESIDENT_X_MAX_BYTES
    x_spec = (pl.BlockSpec((n_pad, d_in), lambda i, k: (0, 0)) if resident
              else pl.BlockSpec((tk, d_in), lambda i, k: (k, 0)))
    vmem = _vmem_limit(n_pad, d_in, d_out, tm, tk, resident,
                       jnp.dtype(out_dtype).itemsize)
    kernel = functools.partial(kernel_fn, tk=tk, resident=resident)
    return pl.pallas_call(
        kernel,
        out_shape=jax.ShapeDtypeStruct((n_pad, d_out), out_dtype),
        grid_spec=pltpu.PrefetchScalarGridSpec(
            num_scalar_prefetch=0,
            grid=grid,
            in_specs=[
                pl.BlockSpec((tm, tk), lambda i, k: (i, k)),
                x_spec,
                pl.BlockSpec((tm, 1), lambda i, k: (i, 0)),
                pl.BlockSpec((d_in, d_out), lambda i, k: (0, 0)),
                pl.BlockSpec((1, d_out), lambda i, k: (0, 0)),
            ],
            out_specs=pl.BlockSpec((tm, d_out), lambda i, k: (i, 0)),
            scratch_shapes=[pltpu.VMEM((tm, d_in), jnp.float32)],
        ),
        compiler_params=pltpu.CompilerParams(
            dimension_semantics=("parallel", "arbitrary"),
            vmem_limit_bytes=vmem),
    )(a_i8, xs, scale, w, b)


def _fused_forward(a_i8, xs0, dinv, dinvsq, w1, b1, w2, b2):
    n_pad = a_i8.shape[0]
    f_pad, h_pad = w1.shape
    c_pad = w2.shape[1]
    dmax = max(f_pad, h_pad, c_pad)
    vmem = int(min(max(4 * n_pad * n_pad + 16 * n_pad * dmax * 4 + (8 << 20),
                       16 << 20), 48 << 20))
    return pl.pallas_call(
        _fused_kernel,
        out_shape=jax.ShapeDtypeStruct((n_pad, c_pad), jnp.float32),
        grid_spec=pltpu.PrefetchScalarGridSpec(
            num_scalar_prefetch=0,
            grid=(1,),
            in_specs=[
                pl.BlockSpec((n_pad, n_pad), lambda i: (0, 0)),
                pl.BlockSpec((n_pad, f_pad), lambda i: (0, 0)),
                pl.BlockSpec((n_pad, 1), lambda i: (0, 0)),
                pl.BlockSpec((n_pad, 1), lambda i: (0, 0)),
                pl.BlockSpec((f_pad, h_pad), lambda i: (0, 0)),
                pl.BlockSpec((1, h_pad), lambda i: (0, 0)),
                pl.BlockSpec((h_pad, c_pad), lambda i: (0, 0)),
                pl.BlockSpec((1, c_pad), lambda i: (0, 0)),
            ],
            out_specs=pl.BlockSpec((n_pad, c_pad), lambda i: (0, 0)),
        ),
        compiler_params=pltpu.CompilerParams(
            dimension_semantics=("arbitrary",),
            vmem_limit_bytes=vmem),
    )(a_i8, xs0, dinv, dinvsq, w1, b1, w2, b2)


# --------------------------- setup (built once per graph / params) ----------
def build_binary_adjacency(edge_index, num_nodes):
    """Exact 0/1 adjacency with self loops.

    Diagonal is forced to 1 (add_remaining_self_loops semantics); duplicate
    edges collapse to a single 0/1 entry.
    """
    src, dst = edge_index[0], edge_index[1]
    a = jnp.zeros((num_nodes, num_nodes), jnp.float32)
    a = a.at[dst, src].set(1.0)                      # message j -> i lands in row i
    idx = jnp.arange(num_nodes)
    a = a.at[idx, idx].set(1.0)
    return a


def _choose_tiles(n):
    if n <= 128:
        return 128, 128
    if n <= 4096:
        return 256, 256
    if n <= 8192:
        return 512, 512
    return 1024, 512


def prepare_graph(edge_index, num_nodes, *, force_tiled=False):
    """One-time per-graph setup: padded int8 (A+I) and the folded D^{-1/2} scales."""
    b = build_binary_adjacency(edge_index, num_nodes)
    deg = jnp.sum(b, axis=1)
    dinv = jnp.where(deg > 0, 1.0 / jnp.sqrt(deg), 0.0)

    fused = (not force_tiled) and (_round_up(num_nodes, LANE) <= _FUSED_MAX_NPAD)
    if fused:
        tm = tk = n_pad = _round_up(num_nodes, LANE)
    else:
        tm, tk = _choose_tiles(num_nodes)
        n_pad = _round_up(num_nodes, tm)      # tm is a multiple of tk

    a_p = jnp.zeros((n_pad, n_pad), jnp.int8).at[:num_nodes, :num_nodes].set(
        b.astype(jnp.int8))
    dinv_p = jnp.zeros((n_pad, 1), jnp.float32).at[:num_nodes, 0].set(dinv)
    return {"a": a_p, "dinv": dinv_p, "dinvsq": dinv_p * dinv_p,
            "n": num_nodes, "n_pad": n_pad, "tm": tm, "tk": tk, "fused": fused}


def prepare_params(w1, b1, w2, b2):
    """One-time parameter padding/casting (weights bf16, biases f32)."""
    f, h = w1.shape
    c = w2.shape[1]
    f_pad, h_pad, c_pad = (_round_up(f, LANE), _round_up(h, LANE),
                           _round_up(c, LANE))
    w1_p = jnp.zeros((f_pad, h_pad), jnp.bfloat16).at[:f, :h].set(
        w1.astype(jnp.bfloat16))
    b1_p = jnp.zeros((1, h_pad), jnp.float32).at[:, :h].set(
        jnp.reshape(b1, (1, h)).astype(jnp.float32))
    w2_p = jnp.zeros((h_pad, c_pad), jnp.bfloat16).at[:h, :c].set(
        w2.astype(jnp.bfloat16))
    # Padded class lanes get a huge negative bias -> masked out of log_softmax.
    b2_p = jnp.full((1, c_pad), -1e30, jnp.float32).at[:, :c].set(
        jnp.reshape(b2, (1, c)).astype(jnp.float32))
    return {"w1": w1_p, "b1": b1_p, "w2": w2_p, "b2": b2_p, "classes": c}


# --------------------------- forward ----------------------------------------
def sgcnet_forward(x, graph, params):
    """SGCNet forward: log_softmax(Ahat^2 relu(Ahat^2 X W1 + b1) W2 + b2)."""
    n, n_pad = graph["n"], graph["n_pad"]
    a_i8, dinv, dinvsq = graph["a"], graph["dinv"], graph["dinvsq"]
    w1, b1, w2, b2 = params["w1"], params["b1"], params["w2"], params["b2"]
    c = params["classes"]
    f = x.shape[1]
    f_pad = w1.shape[0]

    # O(N*F) per-call work only (A padding/casting was hoisted to prepare_graph).
    x_p = jnp.zeros((n_pad, f_pad), jnp.float32).at[:n, :f].set(
        x.astype(jnp.float32))
    xs0 = (dinv * x_p).astype(jnp.bfloat16)      # D^{-1/2} X, pre-scaled input

    if graph["fused"]:
        out = _fused_forward(a_i8, xs0, dinv, dinvsq, w1, b1, w2, b2)
    else:
        tm, tk = graph["tm"], graph["tk"]
        # conv1 (K=2): relu(Ahat^2 X W1 + b1); Ahat^2 = dinv*B*dinvsq*B*dinv
        t1 = _tiled_propagate(a_i8, xs0, dinvsq, tm=tm, tk=tk)
        h1s = _tiled_propagate_lin(a_i8, t1, dinv, w1, b1,
                                   kernel_fn=_prop_lin_relu_kernel,
                                   out_dtype=jnp.bfloat16, tm=tm, tk=tk)
        # conv2 (K=2) + log_softmax (pre-softmax logits == module's embedding)
        t3 = _tiled_propagate(a_i8, h1s, dinvsq, tm=tm, tk=tk)
        out = _tiled_propagate_lin(a_i8, t3, dinv, w2, b2,
                                   kernel_fn=_prop_lin_logsoftmax_kernel,
                                   out_dtype=jnp.float32, tm=tm, tk=tk)
    return out[:n, :c]


# --------------------------- reference & demo --------------------------------
def _reference_forward(x, b_adj, w1, b1, w2, b2):
    deg = jnp.sum(b_adj, axis=1)
    dinv = jnp.where(deg > 0, 1.0 / jnp.sqrt(deg), 0.0)
    ahat = dinv[:, None] * b_adj * dinv[None, :]
    h = ahat @ (ahat @ x)
    h = jnp.maximum(h @ w1 + b1, 0.0)
    h = ahat @ (ahat @ h)
    z = h @ w2 + b2
    return jax.nn.log_softmax(z, axis=1)


if __name__ == "__main__":
    features, neurons, classes = 8, 32, 4
    key = jax.random.PRNGKey(0)
    kx1, kw1, kb1, kw2, kb2, kx2, ke2 = jax.random.split(key, 7)

    w1 = jax.random.normal(kw1, (features, neurons), dtype=jnp.float32) * 0.1
    b1 = jax.random.normal(kb1, (1, neurons), dtype=jnp.float32) * 0.01
    w2 = jax.random.normal(kw2, (neurons, classes), dtype=jnp.float32) * 0.1
    b2 = jax.random.normal(kb2, (1, classes), dtype=jnp.float32) * 0.01
    params = prepare_params(w1, b1, w2, b2)

    # ---- test 1: 16-node graph -> single fused-kernel fast path ----
    n1 = 16
    x1 = jax.random.normal(kx1, (n1, features), dtype=jnp.float32)
    src = jnp.arange(n1, dtype=jnp.int32)
    dst = (src + 1) % n1
    csrc = jnp.array([0, 3, 5, 7], dtype=jnp.int32)
    cdst = jnp.array([8, 11, 13, 15], dtype=jnp.int32)
    ei1 = jnp.stack([jnp.concatenate([src, dst, csrc, cdst]),
                     jnp.concatenate([dst, src, cdst, csrc])], axis=0)
    g1 = prepare_graph(ei1, n1)
    out1 = jax.block_until_ready(sgcnet_forward(x1, g1, params))
    ref1 = _reference_forward(x1, build_binary_adjacency(ei1, n1), w1, b1, w2, b2)
    assert out1.shape == (n1, classes)
    assert jnp.allclose(jnp.sum(jnp.exp(out1), axis=1), 1.0, atol=1e-4)
    assert float(jnp.max(jnp.abs(out1 - ref1))) < 1e-1

    # ---- test 2: 600-node graph -> tiled, pipelined multi-block path ----
    n2 = 600
    x2 = jax.random.normal(kx2, (n2, features), dtype=jnp.float32)
    s2 = jnp.arange(n2, dtype=jnp.int32)
    d2 = (s2 + 1) % n2
    r2 = jax.random.randint(ke2, (2, 4 * n2), 0, n2, dtype=jnp.int32)
    ei2 = jnp.stack([jnp.concatenate([s2, d2, r2[0], r2[1]]),
                     jnp.concatenate([d2, s2, r2[1], r2[0]])], axis=0)
    g2 = prepare_graph(ei2, n2, force_tiled=True)   # grid (3, 3) of 256-tiles
    out2 = jax.block_until_ready(sgcnet_forward(x2, g2, params))
    ref2 = _reference_forward(x2, build_binary_adjacency(ei2, n2), w1, b1, w2, b2)
    assert out2.shape == (n2, classes)
    assert jnp.allclose(jnp.sum(jnp.exp(out2), axis=1), 1.0, atol=1e-4)
    assert float(jnp.max(jnp.abs(out2 - ref2))) < 1e-1

    print("KERNEL_OK")
</pallas_src>

<mosaic_0001>
module attributes {stable_mosaic.version = 11 : i64} {
  func.func @_fused_kernel(%arg0: i32, %arg1: memref<128x128xi8, #tpu.memory_space<vmem>>, %arg2: memref<128x128xbf16, #tpu.memory_space<vmem>>, %arg3: memref<128x1xf32, #tpu.memory_space<vmem>>, %arg4: memref<128x1xf32, #tpu.memory_space<vmem>>, %arg5: memref<128x128xbf16, #tpu.memory_space<vmem>>, %arg6: memref<1x128xf32, #tpu.memory_space<vmem>>, %arg7: memref<128x128xbf16, #tpu.memory_space<vmem>>, %arg8: memref<1x128xf32, #tpu.memory_space<vmem>>, %arg9: memref<128x128xf32, #tpu.memory_space<vmem>>) attributes {dimension_semantics = [#tpu.dimension_semantics<arbitrary>], iteration_bounds = array<i64: 1>, scalar_prefetch = 0 : i64, scratch_operands = 0 : i64, tpu.core_type = #tpu.core_type<tc>, window_params = [{pipeline_mode = #tpu.pipeline_mode<synchronous>, transform_indices = @transform_0, window_bounds = array<i64: 128, 128>}, {pipeline_mode = #tpu.pipeline_mode<synchronous>, transform_indices = @transform_1, window_bounds = array<i64: 128, 128>}, {pipeline_mode = #tpu.pipeline_mode<synchronous>, transform_indices = @transform_2, window_bounds = array<i64: 128, 1>}, {pipeline_mode = #tpu.pipeline_mode<synchronous>, transform_indices = @transform_3, window_bounds = array<i64: 128, 1>}, {pipeline_mode = #tpu.pipeline_mode<synchronous>, transform_indices = @transform_4, window_bounds = array<i64: 128, 128>}, {pipeline_mode = #tpu.pipeline_mode<synchronous>, transform_indices = @transform_5, window_bounds = array<i64: 1, 128>}, {pipeline_mode = #tpu.pipeline_mode<synchronous>, transform_indices = @transform_6, window_bounds = array<i64: 128, 128>}, {pipeline_mode = #tpu.pipeline_mode<synchronous>, transform_indices = @transform_7, window_bounds = array<i64: 1, 128>}, {pipeline_mode = #tpu.pipeline_mode<synchronous>, transform_indices = @transform_8, window_bounds = array<i64: 128, 128>}]} {
    %c0 = arith.constant 0 : index
    %c0_0 = arith.constant 0 : index
    %0 = vector.load %arg1[%c0, %c0_0] : memref<128x128xi8, #tpu.memory_space<vmem>>, vector<128x128xi8>
    %1 = arith.sitofp %0 : vector<128x128xi8> to vector<128x128xbf16>
    %c0_1 = arith.constant 0 : index
    %c0_2 = arith.constant 0 : index
    %2 = vector.load %arg3[%c0_1, %c0_2] : memref<128x1xf32, #tpu.memory_space<vmem>>, vector<128x1xf32>
    %c0_3 = arith.constant 0 : index
    %c0_4 = arith.constant 0 : index
    %3 = vector.load %arg4[%c0_3, %c0_4] : memref<128x1xf32, #tpu.memory_space<vmem>>, vector<128x1xf32>
    %c0_5 = arith.constant 0 : index
    %c0_6 = arith.constant 0 : index
    %4 = vector.load %arg2[%c0_5, %c0_6] : memref<128x128xbf16, #tpu.memory_space<vmem>>, vector<128x128xbf16>
    %cst = arith.constant dense<0.000000e+00> : vector<128x128xf32>
    %5 = tpu.matmul %1, %4, %cst {dimension_numbers = #tpu.dot_dimension_numbers<[1], [0], [0], [1], [0, 0, 1, 1], [], []>} : vector<128x128xbf16>, vector<128x128xbf16>, vector<128x128xf32> -> vector<128x128xf32>
    %6 = vector.broadcast %3 : vector<128x1xf32> to vector<128x128xf32>
    %7 = arith.mulf %5, %6 : vector<128x128xf32>
    %8 = arith.truncf %7 : vector<128x128xf32> to vector<128x128xbf16>
    %cst_7 = arith.constant dense<0.000000e+00> : vector<128x128xf32>
    %9 = tpu.matmul %1, %8, %cst_7 {dimension_numbers = #tpu.dot_dimension_numbers<[1], [0], [0], [1], [0, 0, 1, 1], [], []>} : vector<128x128xbf16>, vector<128x128xbf16>, vector<128x128xf32> -> vector<128x128xf32>
    %10 = vector.broadcast %2 : vector<128x1xf32> to vector<128x128xf32>
    %11 = arith.mulf %9, %10 : vector<128x128xf32>
    %12 = arith.truncf %11 : vector<128x128xf32> to vector<128x128xbf16>
    %c0_8 = arith.constant 0 : index
    %c0_9 = arith.constant 0 : index
    %13 = vector.load %arg5[%c0_8, %c0_9] : memref<128x128xbf16, #tpu.memory_space<vmem>>, vector<128x128xbf16>
    %cst_10 = arith.constant dense<0.000000e+00> : vector<128x128xf32>
    %14 = tpu.matmul %12, %13, %cst_10 {dimension_numbers = #tpu.dot_dimension_numbers<[1], [0], [0], [1], [0, 0, 1, 1], [], []>} : vector<128x128xbf16>, vector<128x128xbf16>, vector<128x128xf32> -> vector<128x128xf32>
    %c0_11 = arith.constant 0 : index
    %c0_12 = arith.constant 0 : index
    %15 = vector.load %arg6[%c0_11, %c0_12] : memref<1x128xf32, #tpu.memory_space<vmem>>, vector<1x128xf32>
    %16 = vector.broadcast %15 : vector<1x128xf32> to vector<128x128xf32>
    %17 = arith.addf %14, %16 : vector<128x128xf32>
    %cst_13 = arith.constant 0.000000e+00 : f32
    %18 = vector.broadcast %cst_13 : f32 to vector<128x128xf32>
    %19 = arith.maximumf %17, %18 : vector<128x128xf32>
    %20 = vector.broadcast %2 : vector<128x1xf32> to vector<128x128xf32>
    %21 = arith.mulf %20, %19 : vector<128x128xf32>
    %22 = arith.truncf %21 : vector<128x128xf32> to vector<128x128xbf16>
    %cst_14 = arith.constant dense<0.000000e+00> : vector<128x128xf32>
    %23 = tpu.matmul %1, %22, %cst_14 {dimension_numbers = #tpu.dot_dimension_numbers<[1], [0], [0], [1], [0, 0, 1, 1], [], []>} : vector<128x128xbf16>, vector<128x128xbf16>, vector<128x128xf32> -> vector<128x128xf32>
    %24 = vector.broadcast %3 : vector<128x1xf32> to vector<128x128xf32>
    %25 = arith.mulf %23, %24 : vector<128x128xf32>
    %26 = arith.truncf %25 : vector<128x128xf32> to vector<128x128xbf16>
    %cst_15 = arith.constant dense<0.000000e+00> : vector<128x128xf32>
    %27 = tpu.matmul %1, %26, %cst_15 {dimension_numbers = #tpu.dot_dimension_numbers<[1], [0], [0], [1], [0, 0, 1, 1], [], []>} : vector<128x128xbf16>, vector<128x128xbf16>, vector<128x128xf32> -> vector<128x128xf32>
    %28 = vector.broadcast %2 : vector<128x1xf32> to vector<128x128xf32>
    %29 = arith.mulf %27, %28 : vector<128x128xf32>
    %30 = arith.truncf %29 : vector<128x128xf32> to vector<128x128xbf16>
    %c0_16 = arith.constant 0 : index
    %c0_17 = arith.constant 0 : index
    %31 = vector.load %arg7[%c0_16, %c0_17] : memref<128x128xbf16, #tpu.memory_space<vmem>>, vector<128x128xbf16>
    %cst_18 = arith.constant dense<0.000000e+00> : vector<128x128xf32>
    %32 = tpu.matmul %30, %31, %cst_18 {dimension_numbers = #tpu.dot_dimension_numbers<[1], [0], [0], [1], [0, 0, 1, 1], [], []>} : vector<128x128xbf16>, vector<128x128xbf16>, vector<128x128xf32> -> vector<128x128xf32>
    %c0_19 = arith.constant 0 : index
    %c0_20 = arith.constant 0 : index
    %33 = vector.load %arg8[%c0_19, %c0_20] : memref<1x128xf32, #tpu.memory_space<vmem>>, vector<1x128xf32>
    %34 = vector.broadcast %33 : vector<1x128xf32> to vector<128x128xf32>
    %35 = arith.addf %32, %34 : vector<128x128xf32>
    %cst_21 = arith.constant dense<0xFF800000> : vector<128xf32>
    %36 = vector.multi_reduction <maximumf>, %35, %cst_21 [1] : vector<128x128xf32> to vector<128xf32>
    %37 = vector.shape_cast %36 : vector<128xf32> to vector<128x1xf32>
    %38 = vector.broadcast %37 : vector<128x1xf32> to vector<128x128xf32>
    %39 = arith.subf %35, %38 : vector<128x128xf32>
    %40 = math.exp %39 : vector<128x128xf32>
    %cst_22 = arith.constant dense<0.000000e+00> : vector<128xf32>
    %41 = vector.multi_reduction <add>, %40, %cst_22 [1] : vector<128x128xf32> to vector<128xf32>
    %42 = vector.shape_cast %41 : vector<128xf32> to vector<128x1xf32>
    %43 = vector.broadcast %37 : vector<128x1xf32> to vector<128x128xf32>
    %44 = arith.subf %35, %43 : vector<128x128xf32>
    %45 = math.log %42 : vector<128x1xf32>
    %46 = vector.broadcast %45 : vector<128x1xf32> to vector<128x128xf32>
    %47 = arith.subf %44, %46 : vector<128x128xf32>
    %c0_23 = arith.constant 0 : index
    %c0_24 = arith.constant 0 : index
    %48 = vector.load %arg9[%c0_23, %c0_24] : memref<128x128xf32, #tpu.memory_space<vmem>>, vector<128x128xf32>
    tpu.vector_store %arg9[%c0_23, %c0_24], %47 {strides = array<i32>} : memref<128x128xf32, #tpu.memory_space<vmem>>, vector<128x128xf32>,
    return
  }
  func.func @transform_0(%arg0: i32) -> (i32, i32) {
    %c0_i32 = arith.constant 0 : i32
    %c0_i32_0 = arith.constant 0 : i32
    %c0_i32_1 = arith.constant 0 : i32
    return %c0_i32, %c0_i32_0 : i32, i32
  }
  func.func @transform_1(%arg0: i32) -> (i32, i32) {
    %c0_i32 = arith.constant 0 : i32
    %c0_i32_0 = arith.constant 0 : i32
    %c0_i32_1 = arith.constant 0 : i32
    return %c0_i32, %c0_i32_0 : i32, i32
  }
  func.func @transform_2(%arg0: i32) -> (i32, i32) {
    %c0_i32 = arith.constant 0 : i32
    %c0_i32_0 = arith.constant 0 : i32
    %c0_i32_1 = arith.constant 0 : i32
    return %c0_i32, %c0_i32_0 : i32, i32
  }
  func.func @transform_3(%arg0: i32) -> (i32, i32) {
    %c0_i32 = arith.constant 0 : i32
    %c0_i32_0 = arith.constant 0 : i32
    %c0_i32_1 = arith.constant 0 : i32
    return %c0_i32, %c0_i32_0 : i32, i32
  }
  func.func @transform_4(%arg0: i32) -> (i32, i32) {
    %c0_i32 = arith.constant 0 : i32
    %c0_i32_0 = arith.constant 0 : i32
    %c0_i32_1 = arith.constant 0 : i32
    return %c0_i32, %c0_i32_0 : i32, i32
  }
  func.func @transform_5(%arg0: i32) -> (i32, i32) {
    %c0_i32 = arith.constant 0 : i32
    %c0_i32_0 = arith.constant 0 : i32
    %c0_i32_1 = arith.constant 0 : i32
    return %c0_i32, %c0_i32_0 : i32, i32
  }
  func.func @transform_6(%arg0: i32) -> (i32, i32) {
    %c0_i32 = arith.constant 0 : i32
    %c0_i32_0 = arith.constant 0 : i32
    %c0_i32_1 = arith.constant 0 : i32
    return %c0_i32, %c0_i32_0 : i32, i32
  }
  func.func @transform_7(%arg0: i32) -> (i32, i32) {
    %c0_i32 = arith.constant 0 : i32
    %c0_i32_0 = arith.constant 0 : i32
    %c0_i32_1 = arith.constant 0 : i32
    return %c0_i32, %c0_i32_0 : i32, i32
  }
  func.func @transform_8(%arg0: i32) -> (i32, i32) {
    %c0_i32 = arith.constant 0 : i32
    %c0_i32_0 = arith.constant 0 : i32
    %c0_i32_1 = arith.constant 0 : i32
    return %c0_i32, %c0_i32_0 : i32, i32
  }
}

</mosaic_0001>

<bundles_post_ra>
// kernel: tpu_custom_call.1
= control target key start
LH: loop header
LB: loop body
LE: loop exit
PB: predicated region body
PF: predicated region fallthrough
CT: control target
= control target key end

     0   :  { %v1325_v1 = vmov 0   ;;  %s1874_s0 = inlined_call_operand.vmem [shape: s8[128,128], index: 0, kind: input, shape index: {}]   ;;  %s1875_s1 = inlined_call_operand.vmem [shape: bf16[128,128], index: 1, kind: input, shape index: {}]   ;;  %s1876_s2 = inlined_call_operand.vmem [shape: f32[128,1], index: 2, kind: input, shape index: {}]   ;;  %s1877_s3 = inlined_call_operand.vmem [shape: f32[128,1], index: 3, kind: input, shape index: {}]   ;;  %s1878_s4 = inlined_call_operand.vmem [shape: bf16[128,128], index: 4, kind: input, shape index: {}]   ;;  %s1879_s5 = inlined_call_operand.vmem [shape: f32[1,128], index: 5, kind: input, shape index: {}]   ;;  %s1880_s6 = inlined_call_operand.vmem [shape: bf16[128,128], index: 6, kind: input, shape index: {}]   ;;  %s1881_s7 = inlined_call_operand.vmem [shape: f32[1,128], index: 7, kind: input, shape index: {}]   ;;  %s1882_s8 = inlined_call_operand.hbm [shape: f32[128,128], index: 8, kind: output, shape index: {}]  }
   0x1   :  { %v1193_v0 = vld [vmem:[%s1875_s1 + $0x38] sm:$0xff]  ;;  %1230 = vset.pattern.permute.xlu0 %v1325_v1  ;;  %v104_v2 = vld [vmem:[%s1877_s3 + $0x70] sm:$0xff]  ;;  %1231 = vset.pattern.permute.xlu1 %v1325_v1  ;;  %v102_v4 = vld [vmem:[%s1877_s3 + $0x60] sm:$0xff] }
   0x2   :  { %170 = vmatpush.bf16.msra.mxu0 %v1193_v0  ;;  %1210 = vmatpush.bf16.msra.mxu2 %v1193_v0  ;;  %v1192_v3 = vld [vmem:[%s1875_s1 + $0x30] sm:$0xff]  ;;  %v1191_v5 = vld [vmem:[%s1875_s1 + $0x28] sm:$0xff] }
   0x3   :  { %291 = vperm.xlu0 %1230, %v104_v2   ;;  %281 = vperm.xlu1 %1231, %v102_v4  }
   0x4   :  { %1232 = vset.pattern.permute.xlu2 %v1325_v1 }
   0x6   :  { %171 = vmatpush.bf16.msra.mxu0 %v1192_v3  ;;  %1211 = vmatpush.bf16.msra.mxu2 %v1192_v3 }
   0x7   :  { %13 = vsyncpa [#allocation3], 0  ;;  %v105_v6 = vld [vmem:[%s1877_s3 + $0x78] sm:$0xff]  ;;  %v103_v7 = vld [vmem:[%s1877_s3 + $0x68] sm:$0xff]  ;;  %s1078_s29 = sshll.u32 %s1882_s8, 4  ;;  %s1327_s30 = smov 128   ;;  %s1079_s29 = int_to_ptr.hbm [resolvable:$true] %s1078_s29 }
   0x8   :  { %v1190_v8 = vld [vmem:[%s1875_s1 + $0x20] sm:$0xff]  ;;  %v1189_v9 = vld [vmem:[%s1875_s1 + $0x18] sm:$0xff]  ;;  %v99_v11 = vld [vmem:[%s1877_s3 + $0x48] sm:$0xff]  ;;  %s1328_s9 = smov 8  }
   0x9   :  { %v98_v10 = vld [vmem:[%s1877_s3 + $0x40] sm:$0xff]  ;;  %v100_v12 = vld [vmem:[%s1877_s3 + $0x50] sm:$0xff]  ;;  %v1187_v20 = vld [vmem:[%s1875_s1 + $0x8] sm:$0xff] }
   0xa   :  { %172 = vmatpush.bf16.msra.mxu0 %v1191_v5  ;;  %1212 = vmatpush.bf16.msra.mxu2 %v1191_v5  ;;  %v1188_v13 = vld [vmem:[%s1875_s1 + $0x10] sm:$0xff]  ;;  %v30_v14 = vld [vmem:[%s1874_s0] sm:$0xff]  ;;  %v97_v21 = vld [vmem:[%s1877_s3 + $0x38] sm:$0xff] }
   0xb   :  { %296 = vperm.xlu0 %1230, %v105_v6   ;;  %286 = vperm.xlu1 %1231, %v103_v7   ;;  %v32_v15 = vld [vmem:[%s1874_s0 + $0x10] sm:$0xff]  ;;  %v34_v16 = vunpack.c.0.s8 %v30_v14  ;;  %v35_v17 = vunpack.c.1.s8 %v30_v14  ;;  %v94_v22 = vld [vmem:[%s1877_s3 + $0x20] sm:$0xff]  ;;  %v101_v27 = vld [vmem:[%s1877_s3 + $0x58] sm:$0xff]  ;;  %v36_v34 = vunpack.c.2.s8 %v30_v14  ;;  %v37_v35 = vunpack.c.3.s8 %v30_v14 }
   0xc   :  { %271 = vperm.xlu2 %1232, %v100_v12   ;;  %v42_v18 = vunpack.c.0.s8 %v32_v15  ;;  %v43_v19 = vunpack.c.1.s8 %v32_v15  ;;  %v1186_v28 = vld [vmem:[%s1875_s1] sm:$0xff]  ;;  %v92_v31 = vld [vmem:[%s1877_s3 + $0x10] sm:$0xff]  ;;  %v93_v32 = vld [vmem:[%s1877_s3 + $0x18] sm:$0xff]  ;;  %v44_v36 = vunpack.c.2.s8 %v32_v15  ;;  %v45_v37 = vunpack.c.3.s8 %v32_v15 }
   0xd   :  { %v50_v23 = vcvt.s32.f32 %v34_v16  ;;  %v51_v24 = vcvt.s32.f32 %v35_v17  ;;  %v96_v33 = vld [vmem:[%s1877_s3 + $0x30] sm:$0xff]  ;;  %v91_v38 = vld [vmem:[%s1877_s3 + $0x8] sm:$0xff]  ;;  %v74_v39 = vld [vmem:[%s1876_s2] sm:$0xff]  ;;  %v52_v40 = vcvt.s32.f32 %v36_v34  ;;  %v53_v41 = vcvt.s32.f32 %v37_v35 }
   0xe   :  { %173 = vmatpush.bf16.msra.mxu0 %v1190_v8  ;;  %1213 = vmatpush.bf16.msra.mxu2 %v1190_v8  ;;  %v58_v25 = vcvt.s32.f32 %v42_v18  ;;  %v59_v26 = vcvt.s32.f32 %v43_v19  ;;  %v60_v42 = vcvt.s32.f32 %v44_v36  ;;  %v61_v43 = vcvt.s32.f32 %v45_v37  ;;  %v95_v44 = vld [vmem:[%s1877_s3 + $0x28] sm:$0xff]  ;;  %v76_v47 = vld [vmem:[%s1876_s2 + $0x10] sm:$0xff]  ;;  %v77_v48 = vld [vmem:[%s1876_s2 + $0x18] sm:$0xff] }
   0xf   :  { %v1434_v29 = vpack.c.bf16 %v51_v24, %v50_v23  ;;  %v1458_v45 = vpack.c.bf16 %v53_v41, %v52_v40  ;;  %v90_v49 = vld [vmem:[%s1877_s3] sm:$0xff]  ;;  %v31_v50 = vld [vmem:[%s1874_s0 + $0x8] sm:$0xff]  ;;  %v33_v51 = vld [vmem:[%s1874_s0 + $0x18] sm:$0xff] }
  0x10   :  { %v1436_v30 = vpack.c.bf16 %v59_v26, %v58_v25  ;;  %v1460_v46 = vpack.c.bf16 %v61_v43, %v60_v42  ;;  %v38_v52 = vunpack.c.0.s8 %v31_v50  ;;  %v39_v53 = vunpack.c.1.s8 %v31_v50  ;;  %v79_v56 = vld [vmem:[%s1876_s2 + $0x28] sm:$0xff]  ;;  %v80_v57 = vld [vmem:[%s1876_s2 + $0x30] sm:$0xff]  ;;  %v82_v1 = vld [vmem:[%s1876_s2 + $0x40] sm:$0xff] }
  0x11   :  { %v46_v54 = vunpack.c.0.s8 %v33_v51  ;;  %v47_v55 = vunpack.c.1.s8 %v33_v51  ;;  %v75_v62 = vld [vmem:[%s1876_s2 + $0x8] sm:$0xff]  ;;  %v78_v3 = vld [vmem:[%s1876_s2 + $0x20] sm:$0xff]  ;;  %v40_v4 = vunpack.c.2.s8 %v31_v50  ;;  %v41_v5 = vunpack.c.3.s8 %v31_v50  ;;  %v85_v8 = vld [vmem:[%s1876_s2 + $0x58] sm:$0xff] }
  0x12   :  { %174 = vmatpush.bf16.msra.mxu0 %v1189_v9  ;;  %1214 = vmatpush.bf16.msra.mxu2 %v1189_v9  ;;  %v54_v58 = vcvt.s32.f32 %v38_v52  ;;  %v55_v59 = vcvt.s32.f32 %v39_v53  ;;  %v83_v2 = vld [vmem:[%s1876_s2 + $0x48] sm:$0xff]  ;;  %v48_v6 = vunpack.c.2.s8 %v33_v51  ;;  %v49_v7 = vunpack.c.3.s8 %v33_v51  ;;  %v86_v9 = vld [vmem:[%s1876_s2 + $0x60] sm:$0xff]  ;;  %v81_v14 = vld [vmem:[%s1876_s2 + $0x38] sm:$0xff] }
  0x13   :  { %261 = vperm.xlu0 %1230, %v98_v10   ;;  %266 = vperm.xlu1 %1231, %v99_v11   ;;  %v62_v60 = vcvt.s32.f32 %v46_v54  ;;  %v63_v61 = vcvt.s32.f32 %v47_v55  ;;  %v56_v10 = vcvt.s32.f32 %v40_v4  ;;  %v57_v11 = vcvt.s32.f32 %v41_v5  ;;  %v88_v17 = vld [vmem:[%s1876_s2 + $0x70] sm:$0xff]  ;;  %v89_v18 = vld [vmem:[%s1876_s2 + $0x78] sm:$0xff] }
  0x14   :  { %276 = vperm.xlu2 %1232, %v101_v27   ;;  %v1488_v63 = vpack.c.bf16 %v55_v59, %v54_v58  ;;  %v64_v12 = vcvt.s32.f32 %v48_v6  ;;  %v84_v19 = vld [vmem:[%s1876_s2 + $0x50] sm:$0xff] }
  0x15   :  { %v1490_v0 = vpack.c.bf16 %v63_v61, %v62_v60  ;;  %v1512_v15 = vpack.c.bf16 %v57_v11, %v56_v10 }
  0x16   :  { %175 = vmatpush.bf16.msra.mxu0 %v1188_v13  ;;  %1215 = vmatpush.bf16.msra.mxu2 %v1188_v13  ;;  %v65_v13 = vcvt.s32.f32 %v49_v7 }
  0x18   :  { %v1514_v16 = vpack.c.bf16 %v65_v13, %v64_v12 }
  0x1a   :  { %176 = vmatpush.bf16.msra.mxu0 %v1187_v20  ;;  %1216 = vmatpush.bf16.msra.mxu2 %v1187_v20  ;;  %v87_v20 = vld [vmem:[%s1876_s2 + $0x68] sm:$0xff] }
  0x1b   :  { %256 = vperm.xlu0 %1230, %v97_v21   ;;  %241 = vperm.xlu1 %1231, %v94_v22  }
  0x1c   :  { %251 = vperm.xlu2 %1232, %v96_v33  }
  0x1e   :  { %177 = vmatpush.bf16.msra.mxu0 %v1186_v28  ;;  %1217 = vmatpush.bf16.msra.mxu2 %v1186_v28 }
  0x21   :  { %178 = vmatmul.bf16.vlgmr.msra.gmra.mxu0 %v1434_v29  ;;  %198 = vmatmul.bf16.vlgmr.msra.gmra.mxu2 %v1436_v30 }
  0x23   :  { %231 = vperm.xlu0 %1230, %v92_v31   ;;  %236 = vperm.xlu1 %1231, %v93_v32  }
  0x24   :  { %246 = vperm.xlu2 %1232, %v95_v44  }
  0x2b   :  { %226 = vperm.xlu0 %1230, %v91_v38   ;;  %374 = vperm.xlu1 %1231, %v74_v39  }
  0x2c   :  { %221 = vperm.xlu2 %1232, %v90_v49  }
  0x31   :  { %183 = vmatmul.bf16.gmra.mxu0 %v1458_v45  ;;  %203 = vmatmul.bf16.gmra.mxu2 %v1460_v46 }
  0x33   :  { %384 = vperm.xlu0 %1230, %v76_v47   ;;  %389 = vperm.xlu1 %1231, %v77_v48  }
  0x34   :  { %379 = vperm.xlu2 %1232, %v75_v62  }
  0x3b   :  { %399 = vperm.xlu0 %1230, %v79_v56   ;;  %404 = vperm.xlu1 %1231, %v80_v57  }
  0x3c   :  { %394 = vperm.xlu2 %1232, %v78_v3  }
  0x41   :  { %188 = vmatmul.bf16.gmra.mxu0 %v1488_v63  ;;  %208 = vmatmul.bf16.gmra.mxu2 %v1490_v0 }
  0x43   :  { %414 = vperm.xlu0 %1230, %v82_v1   ;;  %419 = vperm.xlu1 %1231, %v83_v2  }
  0x44   :  { %409 = vperm.xlu2 %1232, %v81_v14  }
  0x4b   :  { %429 = vperm.xlu0 %1230, %v85_v8   ;;  %434 = vperm.xlu1 %1231, %v86_v9  }
  0x4c   :  { %424 = vperm.xlu2 %1232, %v84_v19  }
  0x51   :  { %193 = vmatmul.bf16.gmra.mxu0 %v1512_v15  ;;  %213 = vmatmul.bf16.gmra.mxu2 %v1514_v16 }
  0x53   :  { %444 = vperm.xlu0 %1230, %v88_v17   ;;  %449 = vperm.xlu1 %1231, %v89_v18  }
  0x54   :  { %439 = vperm.xlu2 %1232, %v87_v20  }
  0x66   :  { %v1538_v37 = vpop.permute.xlu2 %271 }
  0x6e   :  { %v1544_v42 = vpop.permute.xlu2 %276 }
  0x75   :  { %v1532_v31 = vpop.permute.xlu0 %291  ;;  %v1534_v33 = vpop.permute.xlu1 %281 }
  0x76   :  { %v1554_v54 = vpop.permute.xlu2 %251 }
  0x7d   :  { %v1536_v36 = vpop.permute.xlu0 %296  ;;  %v1540_v38 = vpop.permute.xlu1 %286 }
  0x7e   :  { %v1566_v5 = vpop.permute.xlu2 %246 }
  0x85   :  { %v1542_v41 = vpop.permute.xlu0 %261  ;;  %v1548_v48 = vpop.permute.xlu1 %266 }
  0x86   :  { %v1576_v14 = vpop.permute.xlu2 %221 }
  0x8d   :  { %v1552_v53 = vpop.permute.xlu0 %256  ;;  %v1559_v60 = vpop.permute.xlu1 %241 }
  0x95   :  { %v1564_v4 = vpop.permute.xlu0 %231  ;;  %v1570_v9 = vpop.permute.xlu1 %236 }
  0x9d   :  { %v1574_v13 = vpop.permute.xlu0 %226 }
  0x9e   :  { %v1530_v21 = vpop.f32.mrf.mxu0 }
  0x9f   :  { %v299_v18 = vmul.f32 %v1576_v14, %v1530_v21  ;;  %v1200_v21 = vld [vmem:[%s1878_s4 + $0x30] sm:$0xff] }
  0xa4   :  { %v199_v22 = vpop.f32.mrf.mxu2 }
  0xa5   :  { %v307_v62 = vmul.f32 %v1542_v41, %v199_v22  ;;  %v1201_v22 = vld [vmem:[%s1878_s4 + $0x38] sm:$0xff] }
  0xa6   :  { %v181_v23 = vpop.f32.mrf.mxu0  ;;  %544 = vmatpush.bf16.msrb.mxu2 %v1201_v22 }
  0xa7   :  { %v300_v17 = vmul.f32 %v1574_v13, %v181_v23  ;;  %v1199_v23 = vld [vmem:[%s1878_s4 + $0x28] sm:$0xff] }
  0xa9   :  { %v315_v20 = vpack.c.bf16 %v300_v17, %v299_v18 }
  0xaa   :  { %545 = vmatpush.bf16.msrb.mxu2 %v1200_v21 }
  0xac   :  { %v201_v24 = vpop.f32.mrf.mxu2 }
  0xad   :  { %v308_v58 = vmul.f32 %v1548_v48, %v201_v24  ;;  %v1198_v24 = vld [vmem:[%s1878_s4 + $0x20] sm:$0xff] }
  0xae   :  { %v184_v26 = vpop.f32.mrf.mxu0  ;;  %546 = vmatpush.bf16.msrb.mxu2 %v1199_v23 }
  0xaf   :  { %v319_v3 = vpack.c.bf16 %v308_v58, %v307_v62  ;;  %v301_v10 = vmul.f32 %v1564_v4, %v184_v26  ;;  %v1196_v26 = vld [vmem:[%s1878_s4 + $0x10] sm:$0xff] }
  0xb2   :  { %547 = vmatpush.bf16.msrb.mxu2 %v1198_v24 }
  0xb4   :  { %v204_v25 = vpop.f32.mrf.mxu2 }
  0xb5   :  { %v309_v57 = vmul.f32 %v1538_v37, %v204_v25  ;;  %v1197_v25 = vld [vmem:[%s1878_s4 + $0x18] sm:$0xff] }
  0xb6   :  { %v186_v28 = vpop.f32.mrf.mxu0  ;;  %548 = vmatpush.bf16.msrb.mxu2 %v1197_v25 }
  0xb7   :  { %v302_v11 = vmul.f32 %v1570_v9, %v186_v28  ;;  %v1194_v28 = vld [vmem:[%s1878_s4] sm:$0xff] }
  0xb9   :  { %v316_v19 = vpack.c.bf16 %v302_v11, %v301_v10 }
  0xba   :  { %549 = vmatpush.bf16.msrb.mxu2 %v1196_v26 }
  0xbc   :  { %v206_v27 = vpop.f32.mrf.mxu2 }
  0xbd   :  { %v310_v55 = vmul.f32 %v1544_v42, %v206_v27  ;;  %v1195_v27 = vld [vmem:[%s1878_s4 + $0x8] sm:$0xff] }
  0xbe   :  { %v189_v34 = vpop.f32.mrf.mxu0  ;;  %550 = vmatpush.bf16.msrb.mxu2 %v1195_v27 }
  0xbf   :  { %v320_v59 = vpack.c.bf16 %v310_v55, %v309_v57  ;;  %v303_v6 = vmul.f32 %v1559_v60, %v189_v34  ;;  %v1613_v34 = vpop.permute.xlu2 %379 }
  0xc2   :  { %551 = vmatpush.bf16.msrb.mxu2 %v1194_v28 }
  0xc4   :  { %v209_v32 = vpop.f32.mrf.mxu2 }
  0xc5   :  { %v311_v52 = vmul.f32 %v1534_v33, %v209_v32 }
  0xc6   :  { %v191_v39 = vpop.f32.mrf.mxu0 }
  0xc7   :  { %v304_v7 = vmul.f32 %v1566_v5, %v191_v39  ;;  %v1625_v58 = vpop.permute.xlu2 %394 }
  0xc8   :  { %1891 = vst [vmem:[#allocation7_spill] sm:$0xff] %v1625_v58 }
  0xc9   :  { %v317_v12 = vpack.c.bf16 %v304_v7, %v303_v6 }
  0xcc   :  { %v211_v35 = vpop.f32.mrf.mxu2 }
  0xcd   :  { %v312_v50 = vmul.f32 %v1540_v38, %v211_v35  ;;  %v1615_v35 = vpop.permute.xlu1 %374 }
  0xce   :  { %v194_v49 = vpop.f32.mrf.mxu0 }
  0xcf   :  { %v321_v56 = vpack.c.bf16 %v312_v50, %v311_v52  ;;  %v305_v1 = vmul.f32 %v1554_v54, %v194_v49  ;;  %v1619_v49 = vpop.permute.xlu0 %384 }
  0xd0   :  { %1889 = vst [vmem:[#allocation5_spill] sm:$0xff] %v1619_v49 }
  0xd4   :  { %v214_v40 = vpop.f32.mrf.mxu2 }
  0xd5   :  { %v313_v44 = vmul.f32 %v1532_v31, %v214_v40  ;;  %v1621_v50 = vpop.permute.xlu1 %389 }
  0xd6   :  { %v196_v61 = vpop.f32.mrf.mxu0  ;;  %1890 = vst [vmem:[#allocation6_spill] sm:$0xff] %v1621_v50 }
  0xd7   :  { %v306_v2 = vmul.f32 %v1552_v53, %v196_v61 }
  0xd9   :  { %v318_v8 = vpack.c.bf16 %v306_v2, %v305_v1 }
  0xdc   :  { %v216_v43 = vpop.f32.mrf.mxu2 }
  0xdd   :  { %v314_v47 = vmul.f32 %v1536_v36, %v216_v43  ;;  %v1631_v7 = vpop.permute.xlu1 %404 }
  0xde   :  { %1893 = vst [vmem:[#allocation9_spill] sm:$0xff] %v1631_v7 }
  0xdf   :  { %v322_v51 = vpack.c.bf16 %v314_v47, %v313_v44 }
  0xe1   :  { %323 = vmatpush.bf16.msra.mxu1 %v322_v51  ;;  %1218 = vmatpush.bf16.msra.mxu3 %v322_v51 }
  0xe5   :  { %324 = vmatpush.bf16.msra.mxu1 %v321_v56  ;;  %1219 = vmatpush.bf16.msra.mxu3 %v321_v56 }
  0xe9   :  { %325 = vmatpush.bf16.msra.mxu1 %v320_v59  ;;  %1220 = vmatpush.bf16.msra.mxu3 %v320_v59  ;;  %v1627_v59 = vpop.permute.xlu0 %399 }
  0xea   :  { %1892 = vst [vmem:[#allocation8_spill] sm:$0xff] %v1627_v59 }
  0xed   :  { %326 = vmatpush.bf16.msra.mxu1 %v319_v3  ;;  %1221 = vmatpush.bf16.msra.mxu3 %v319_v3 }
  0xf1   :  { %327 = vmatpush.bf16.msra.mxu1 %v318_v8  ;;  %1222 = vmatpush.bf16.msra.mxu3 %v318_v8  ;;  %v1633_v8 = vpop.permute.xlu2 %409  ;;  %v1640_v21 = vpop.permute.xlu0 %414 }
  0xf2   :  { %1894 = vst [vmem:[#allocation10_spill] sm:$0xff] %v1633_v8 }
  0xf5   :  { %328 = vmatpush.bf16.msra.mxu1 %v317_v12  ;;  %1223 = vmatpush.bf16.msra.mxu3 %v317_v12 }
  0xf9   :  { %329 = vmatpush.bf16.msra.mxu1 %v316_v19  ;;  %1224 = vmatpush.bf16.msra.mxu3 %v316_v19  ;;  %v1643_v26 = vpop.permute.xlu0 %429 }
  0xfd   :  { %330 = vmatpush.bf16.msra.mxu1 %v315_v20  ;;  %1225 = vmatpush.bf16.msra.mxu3 %v315_v20  ;;  %v1637_v20 = vpop.permute.xlu1 %419 }
 0x100   :  { %331 = vmatmul.bf16.vlgmr.msra.gmra.mxu1 %v1434_v29  ;;  %351 = vmatmul.bf16.vlgmr.msra.gmra.mxu3 %v1436_v30 }
 0x110   :  { %336 = vmatmul.bf16.gmra.mxu1 %v1458_v45  ;;  %356 = vmatmul.bf16.gmra.mxu3 %v1460_v46 }
 0x120   :  { %341 = vmatmul.bf16.gmra.mxu1 %v1488_v63  ;;  %361 = vmatmul.bf16.gmra.mxu3 %v1490_v0 }
 0x130   :  { %346 = vmatmul.bf16.gmra.mxu1 %v1512_v15  ;;  %366 = vmatmul.bf16.gmra.mxu3 %v1514_v16 }
 0x17d   :  { %v332_v32 = vpop.f32.mrf.mxu1 }
 0x17e   :  { %v452_v40 = vmul.f32 %v1615_v35, %v332_v32  ;;  %v1646_v32 = vpop.permute.xlu2 %424 }
 0x183   :  { %v352_v3 = vpop.f32.mrf.mxu3 }
 0x184   :  { %v460_v23 = vmul.f32 %v1640_v21, %v352_v3 }
 0x185   :  { %v334_v39 = vpop.f32.mrf.mxu1 }
 0x186   :  { %v453_v43 = vmul.f32 %v1613_v34, %v334_v39 }
 0x188   :  { %v468_v44 = vpack.c.bf16 %v453_v43, %v452_v40 }
 0x18a   :  { %552 = vmatmul.bf16.vlgmr.msrb.gmra.mxu2 %v468_v44  ;;  %v1649_v44 = vpop.permute.xlu2 %439 }
 0x18b   :  { %v354_v10 = vpop.f32.mrf.mxu3 }
 0x18c   :  { %v461_v22 = vmul.f32 %v1637_v20, %v354_v10  ;;  %v1233_v10 = vld [vmem:[%s1879_s5] ss:$0 sm:$0xff] }
 0x18d   :  { %v337_v47 = vpop.f32.mrf.mxu1 }
 0x18e   :  { %v454_v52 = vmul.f32 %v1619_v49, %v337_v47  ;;  %v472_v24 = vpack.c.bf16 %v461_v22, %v460_v23 }
 0x193   :  { %v357_v19 = vpop.f32.mrf.mxu3 }
 0x194   :  { %v462_v39 = vmul.f32 %v1646_v32, %v357_v19 }
 0x195   :  { %v339_v51 = vpop.f32.mrf.mxu1 }
 0x196   :  { %v455_v55 = vmul.f32 %v1621_v50, %v339_v51  ;;  %v1652_v51 = vpop.permute.xlu1 %434 }
 0x198   :  { %v469_v56 = vpack.c.bf16 %v455_v55, %v454_v52 }
 0x19a   :  { %557 = vmatmul.bf16.gmra.mxu2 %v469_v56 }
 0x19b   :  { %v359_v25 = vpop.f32.mrf.mxu3 }
 0x19c   :  { %v463_v28 = vmul.f32 %v1643_v26, %v359_v25 }
 0x19d   :  { %v342_v57 = vpop.f32.mrf.mxu1 }
 0x19e   :  { %v456_v62 = vmul.f32 %v1625_v58, %v342_v57  ;;  %v473_v40 = vpack.c.bf16 %v463_v28, %v462_v39 }
 0x1a3   :  { %v362_v27 = vpop.f32.mrf.mxu3 }
 0x1a4   :  { %v464_v52 = vmul.f32 %v1652_v51, %v362_v27 }
 0x1a5   :  { %v344_v61 = vpop.f32.mrf.mxu1 }
 0x1a6   :  { %v457_v1 = vmul.f32 %v1627_v59, %v344_v61  ;;  %v1655_v61 = vpop.permute.xlu1 %449 }
 0x1a8   :  { %v470_v2 = vpack.c.bf16 %v457_v1, %v456_v62  ;;  %v1658_v1 = vpop.permute.xlu0 %444 }
 0x1aa   :  { %562 = vmatmul.bf16.gmra.mxu2 %v470_v2 }
 0x1ab   :  { %v364_v43 = vpop.f32.mrf.mxu3 }
 0x1ac   :  { %v465_v47 = vmul.f32 %v1649_v44, %v364_v43 }
 0x1ad   :  { %v347_v6 = vpop.f32.mrf.mxu1 }
 0x1ae   :  { %v458_v12 = vmul.f32 %v1631_v7, %v347_v6  ;;  %v474_v56 = vpack.c.bf16 %v465_v47, %v464_v52 }
 0x1b3   :  { %v367_v55 = vpop.f32.mrf.mxu3 }
 0x1b4   :  { %v466_v2 = vmul.f32 %v1658_v1, %v367_v55 }
 0x1b5   :  { %v349_v11 = vpop.f32.mrf.mxu1 }
 0x1b6   :  { %v459_v17 = vmul.f32 %v1633_v8, %v349_v11 }
 0x1b8   :  { %v471_v18 = vpack.c.bf16 %v459_v17, %v458_v12 }
 0x1ba   :  { %567 = vmatmul.bf16.gmra.mxu2 %v471_v18 }
 0x1bb   :  { %v369_v57 = vpop.f32.mrf.mxu3 }
 0x1bc   :  { %v467_v62 = vmul.f32 %v1655_v61, %v369_v57 }
 0x1be   :  { %v475_v3 = vpack.c.bf16 %v467_v62, %v466_v2 }
 0x1ca   :  { %572 = vmatmul.bf16.gmra.mxu2 %v472_v24 }
 0x1da   :  { %577 = vmatmul.bf16.gmra.mxu2 %v473_v40 }
 0x1ea   :  { %582 = vmatmul.bf16.gmra.mxu2 %v474_v56 }
 0x1fa   :  { %587 = vmatmul.bf16.gmra.mxu2 %v475_v3 }
 0x20d   :  { %v553_v6 = vpop.f32.mrf.mxu2 }
 0x20e   :  { %v554_v11 = vadd.f32 %v1233_v10, %v553_v6 }
 0x210   :  { %v593_v17 = vmax.f32 %v554_v11, 0.0 }
 0x212   :  { %v1665_v22 = vmul.f32 %v593_v17, %v1615_v35 }
 0x215   :  { %v555_v12 = vpop.f32.mrf.mxu2 }
 0x216   :  { %v556_v18 = vadd.f32 %v1233_v10, %v555_v12 }
 0x218   :  { %v594_v19 = vmax.f32 %v556_v18, 0.0 }
 0x21a   :  { %v1668_v23 = vmul.f32 %v594_v19, %v1613_v34 }
 0x21d   :  { %v558_v25 = vpop.f32.mrf.mxu2 }
 0x21e   :  { %v559_v27 = vadd.f32 %v1233_v10, %v558_v25 }
 0x220   :  { %v595_v39 = vmax.f32 %v559_v27, 0.0 }
 0x222   :  { %v1673_v47 = vmul.f32 %v595_v39, %v1619_v49 }
 0x225   :  { %v560_v28 = vpop.f32.mrf.mxu2 }
 0x226   :  { %v561_v40 = vadd.f32 %v1233_v10, %v560_v28 }
 0x228   :  { %v596_v43 = vmax.f32 %v561_v40, 0.0 }
 0x22a   :  { %v612_v52 = vmul.f32 %v596_v43, %v1621_v50 }
 0x22c   :  { %v626_v55 = vpack.c.bf16 %v612_v52, %v1673_v47 }
 0x22d   :  { %v563_v56 = vpop.f32.mrf.mxu2 }
 0x22e   :  { %v564_v57 = vadd.f32 %v1233_v10, %v563_v56 }
 0x230   :  { %v597_v2 = vmax.f32 %v564_v57, 0.0 }
 0x232   :  { %v613_v11 = vmul.f32 %v597_v2, %v1625_v58 }
 0x235   :  { %v565_v62 = vpop.f32.mrf.mxu2 }
 0x236   :  { %v566_v3 = vadd.f32 %v1233_v10, %v565_v62 }
 0x238   :  { %v598_v6 = vmax.f32 %v566_v3, 0.0 }
 0x23a   :  { %v614_v12 = vmul.f32 %v598_v6, %v1627_v59 }
 0x23c   :  { %v627_v17 = vpack.c.bf16 %v614_v12, %v613_v11 }
 0x23d   :  { %v568_v18 = vpop.f32.mrf.mxu2 }
 0x23e   :  { %v569_v19 = vadd.f32 %v1233_v10, %v568_v18 }
 0x240   :  { %v599_v27 = vmax.f32 %v569_v19, 0.0 }
 0x242   :  { %v615_v40 = vmul.f32 %v599_v27, %v1631_v7 }
 0x245   :  { %v570_v25 = vpop.f32.mrf.mxu2 }
 0x246   :  { %v571_v28 = vadd.f32 %v1233_v10, %v570_v25 }
 0x248   :  { %v600_v39 = vmax.f32 %v571_v28, 0.0 }
 0x24a   :  { %v616_v43 = vmul.f32 %v600_v39, %v1633_v8 }
 0x24c   :  { %v628_v47 = vpack.c.bf16 %v616_v43, %v615_v40 }
 0x24d   :  { %v573_v52 = vpop.f32.mrf.mxu2 }
 0x255   :  { %v575_v56 = vpop.f32.mrf.mxu2 }
 0x256   :  { %v576_v43 = vadd.f32 %v1233_v10, %v575_v56 }
 0x25d   :  { %v578_v57 = vpop.f32.mrf.mxu2 }
 0x25e   :  { %v579_v27 = vadd.f32 %v1233_v10, %v578_v57 }
 0x265   :  { %v580_v62 = vpop.f32.mrf.mxu2 }
 0x266   :  { %v581_v25 = vadd.f32 %v1233_v10, %v580_v62 }
 0x268   :  { %v604_v8 = vmax.f32 %v581_v25, 0.0 }
 0x26a   :  { %v620_v62 = vmul.f32 %v604_v8, %v1643_v26 }
 0x26d   :  { %v583_v3 = vpop.f32.mrf.mxu2 }
 0x26e   :  { %v584_v18 = vadd.f32 %v1233_v10, %v583_v3 }
 0x270   :  { %v605_v7 = vmax.f32 %v584_v18, 0.0 }
 0x272   :  { %v621_v3 = vmul.f32 %v605_v7, %v1652_v51 }
 0x275   :  { %v585_v2 = vpop.f32.mrf.mxu2 }
 0x276   :  { %v586_v11 = vadd.f32 %v1233_v10, %v585_v2  ;;  %v603_v2 = vmax.f32 %v579_v27, 0.0 }
 0x278   :  { %v606_v28 = vmax.f32 %v586_v11, 0.0 }
 0x27a   :  { %v622_v50 = vmul.f32 %v606_v28, %v1649_v44 }
 0x27c   :  { %v631_v11 = vpack.c.bf16 %v622_v50, %v621_v3 }
 0x27d   :  { %v588_v24 = vpop.f32.mrf.mxu2 }
 0x27e   :  { %v589_v6 = vadd.f32 %v1233_v10, %v588_v24  ;;  %v574_v24 = vadd.f32 %v1233_v10, %v573_v52 }
 0x280   :  { %v607_v59 = vmax.f32 %v589_v6, 0.0  ;;  %v602_v6 = vmax.f32 %v576_v43, 0.0  ;;  %v601_v57 = vmax.f32 %v574_v24, 0.0 }
 0x282   :  { %v623_v39 = vmul.f32 %v607_v59, %v1658_v1  ;;  %v617_v56 = vmul.f32 %v601_v57, %v1640_v21 }
 0x285   :  { %v590_v12 = vpop.f32.mrf.mxu2 }
 0x286   :  { %v591_v19 = vadd.f32 %v1233_v10, %v590_v12  ;;  %v619_v12 = vmul.f32 %v603_v2, %v1646_v32 }
 0x288   :  { %v608_v58 = vmax.f32 %v591_v19, 0.0  ;;  %v630_v59 = vpack.c.bf16 %v620_v62, %v619_v12 }
 0x28a   :  { %v624_v40 = vmul.f32 %v608_v58, %v1655_v61  ;;  %v618_v58 = vmul.f32 %v602_v6, %v1637_v20 }
 0x28c   :  { %v632_v49 = vpack.c.bf16 %v624_v40, %v623_v39  ;;  %v629_v18 = vpack.c.bf16 %v618_v58, %v617_v56 }
 0x28e   :  { %633 = vmatpush.bf16.msrb.mxu3 %v632_v49  ;;  %v1895_v49 = vpack.c.bf16 %v1668_v23, %v1665_v22 }
 0x292   :  { %634 = vmatpush.bf16.msrb.mxu3 %v631_v11 }
 0x296   :  { %635 = vmatpush.bf16.msrb.mxu3 %v630_v59 }
 0x29a   :  { %636 = vmatpush.bf16.msrb.mxu3 %v629_v18 }
 0x29e   :  { %637 = vmatpush.bf16.msrb.mxu3 %v628_v47 }
 0x2a2   :  { %638 = vmatpush.bf16.msrb.mxu3 %v627_v17 }
 0x2a6   :  { %639 = vmatpush.bf16.msrb.mxu3 %v626_v55 }
 0x2aa   :  { %640 = vmatpush.bf16.msrb.mxu3 %v1895_v49 }
 0x2ad   :  { %641 = vmatmul.bf16.vlgmr.msrb.gmra.mxu3 %v1434_v29 }
 0x2bd   :  { %646 = vmatmul.bf16.gmra.mxu3 %v1458_v45 }
 0x2cd   :  { %651 = vmatmul.bf16.gmra.mxu3 %v1488_v63 }
 0x2dd   :  { %656 = vmatmul.bf16.gmra.mxu3 %v1512_v15 }
 0x2ed   :  { %661 = vmatmul.bf16.gmra.mxu3 %v1436_v30 }
 0x2fd   :  { %666 = vmatmul.bf16.gmra.mxu3 %v1460_v46 }
 0x30d   :  { %671 = vmatmul.bf16.gmra.mxu3 %v1490_v0 }
 0x31d   :  { %676 = vmatmul.bf16.gmra.mxu3 %v1514_v16 }
 0x330   :  { %v642_v50 = vpop.f32.mrf.mxu3 }
 0x331   :  { %v682_v8 = vmul.f32 %v642_v50, %v1576_v14 }
 0x338   :  { %v644_v7 = vpop.f32.mrf.mxu3 }
 0x339   :  { %v683_v10 = vmul.f32 %v644_v7, %v1574_v13 }
 0x33b   :  { %v698_v22 = vpack.c.bf16 %v683_v10, %v682_v8  ;;  %v1896_v10 = vld [vmem:[#allocation5_spill] sm:$0xff] }
 0x340   :  { %v647_v23 = vpop.f32.mrf.mxu3 }
 0x341   :  { %v684_v17 = vmul.f32 %v647_v23, %v1564_v4 }
 0x348   :  { %v649_v55 = vpop.f32.mrf.mxu3 }
 0x349   :  { %v685_v47 = vmul.f32 %v649_v55, %v1570_v9 }
 0x34b   :  { %v699_v52 = vpack.c.bf16 %v685_v47, %v684_v17 }
 0x350   :  { %v652_v19 = vpop.f32.mrf.mxu3 }
 0x351   :  { %v686_v28 = vmul.f32 %v652_v19, %v1559_v60  ;;  %v1899_v19 = vld [vmem:[#allocation8_spill] sm:$0xff] }
 0x358   :  { %v654_v25 = vpop.f32.mrf.mxu3 }
 0x359   :  { %v687_v27 = vmul.f32 %v654_v25, %v1566_v5 }
 0x35b   :  { %v700_v39 = vpack.c.bf16 %v687_v27, %v686_v28  ;;  %v1900_v27 = vld [vmem:[#allocation9_spill] sm:$0xff] }
 0x360   :  { %v657_v40 = vpop.f32.mrf.mxu3 }
 0x361   :  { %v688_v14 = vmul.f32 %v657_v40, %v1554_v54  ;;  %v1901_v40 = vld [vmem:[#allocation10_spill] sm:$0xff] }
 0x368   :  { %v659_v43 = vpop.f32.mrf.mxu3 }
 0x369   :  { %v689_v13 = vmul.f32 %v659_v43, %v1552_v53 }
 0x36b   :  { %v701_v24 = vpack.c.bf16 %v689_v13, %v688_v14 }
 0x370   :  { %v662_v2 = vpop.f32.mrf.mxu3 }
 0x371   :  { %v690_v50 = vmul.f32 %v662_v2, %v1542_v41 }
 0x378   :  { %v664_v3 = vpop.f32.mrf.mxu3 }
 0x379   :  { %v691_v18 = vmul.f32 %v664_v3, %v1548_v48 }
 0x380   :  { %v667_v4 = vpop.f32.mrf.mxu3 }
 0x381   :  { %v692_v56 = vmul.f32 %v667_v4, %v1538_v37 }
 0x388   :  { %v669_v6 = vpop.f32.mrf.mxu3 }
 0x389   :  { %v693_v53 = vmul.f32 %v669_v6, %v1544_v42 }
 0x38b   :  { %v703_v49 = vpack.c.bf16 %v693_v53, %v692_v56 }
 0x390   :  { %v672_v9 = vpop.f32.mrf.mxu3 }
 0x391   :  { %v694_v54 = vmul.f32 %v672_v9, %v1534_v33  ;;  %v1209_v33 = vld [vmem:[%s1880_s6 + $0x38] sm:$0xff] }
 0x392   :  { %847 = vmatpush.bf16.msrb.mxu1 %v1209_v33 }
 0x398   :  { %v674_v62 = vpop.f32.mrf.mxu3 }
 0x399   :  { %v695_v12 = vmul.f32 %v674_v62, %v1540_v38 }
 0x39b   :  { %v704_v59 = vpack.c.bf16 %v695_v12, %v694_v54 }
 0x3a0   :  { %v677_v11 = vpop.f32.mrf.mxu3 }
 0x3a1   :  { %v696_v60 = vmul.f32 %v677_v11, %v1532_v31  ;;  %v702_v31 = vpack.c.bf16 %v691_v18, %v690_v50 }
 0x3a8   :  { %v679_v57 = vpop.f32.mrf.mxu3 }
 0x3a9   :  { %v697_v5 = vmul.f32 %v679_v57, %v1536_v36  ;;  %v1208_v36 = vld [vmem:[%s1880_s6 + $0x30] sm:$0xff] }
 0x3aa   :  { %848 = vmatpush.bf16.msrb.mxu1 %v1208_v36 }
 0x3ab   :  { %v705_v58 = vpack.c.bf16 %v697_v5, %v696_v60 }
 0x3ad   :  { %706 = vmatpush.bf16.msrb.mxu0 %v705_v58 }
 0x3b1   :  { %707 = vmatpush.bf16.msrb.mxu0 %v704_v59 }
 0x3b5   :  { %708 = vmatpush.bf16.msrb.mxu0 %v703_v49 }
 0x3b9   :  { %709 = vmatpush.bf16.msrb.mxu0 %v702_v31 }
 0x3bd   :  { %710 = vmatpush.bf16.msrb.mxu0 %v701_v24 }
 0x3c1   :  { %711 = vmatpush.bf16.msrb.mxu0 %v700_v39 }
 0x3c5   :  { %712 = vmatpush.bf16.msrb.mxu0 %v699_v52  ;;  %v1898_v52 = vld [vmem:[#allocation7_spill] sm:$0xff] }
 0x3c9   :  { %713 = vmatpush.bf16.msrb.mxu0 %v698_v22  ;;  %v1897_v22 = vld [vmem:[#allocation6_spill] sm:$0xff] }
 0x3cc   :  { %714 = vmatmul.bf16.vlgmr.msrb.gmra.mxu0 %v1434_v29  ;;  %v1207_v29 = vld [vmem:[%s1880_s6 + $0x28] sm:$0xff] }
 0x3cd   :  { %849 = vmatpush.bf16.msrb.mxu1 %v1207_v29 }
 0x3dc   :  { %719 = vmatmul.bf16.gmra.mxu0 %v1458_v45  ;;  %v1205_v45 = vld [vmem:[%s1880_s6 + $0x18] sm:$0xff] }
 0x3ec   :  { %724 = vmatmul.bf16.gmra.mxu0 %v1488_v63  ;;  %v1204_v63 = vld [vmem:[%s1880_s6 + $0x10] sm:$0xff] }
 0x3fc   :  { %729 = vmatmul.bf16.gmra.mxu0 %v1512_v15  ;;  %v1202_v15 = vld [vmem:[%s1880_s6] sm:$0xff] }
 0x40c   :  { %734 = vmatmul.bf16.gmra.mxu0 %v1436_v30  ;;  %v1206_v30 = vld [vmem:[%s1880_s6 + $0x20] sm:$0xff] }
 0x40d   :  { %850 = vmatpush.bf16.msrb.mxu1 %v1206_v30 }
 0x411   :  { %851 = vmatpush.bf16.msrb.mxu1 %v1205_v45 }
 0x415   :  { %852 = vmatpush.bf16.msrb.mxu1 %v1204_v63 }
 0x41c   :  { %739 = vmatmul.bf16.gmra.mxu0 %v1460_v46  ;;  %v1203_v46 = vld [vmem:[%s1880_s6 + $0x8] sm:$0xff] }
 0x41d   :  { %853 = vmatpush.bf16.msrb.mxu1 %v1203_v46 }
 0x421   :  { %854 = vmatpush.bf16.msrb.mxu1 %v1202_v15 }
 0x42c   :  { %744 = vmatmul.bf16.gmra.mxu0 %v1490_v0 }
 0x43c   :  { %749 = vmatmul.bf16.gmra.mxu0 %v1514_v16 }
 0x449   :  { %v715_v37 = vpop.f32.mrf.mxu0 }
 0x44a   :  { %v755_v41 = vmul.f32 %v715_v37, %v1615_v35 }
 0x451   :  { %v717_v38 = vpop.f32.mrf.mxu0 }
 0x452   :  { %v756_v42 = vmul.f32 %v717_v38, %v1613_v34 }
 0x454   :  { %v771_v48 = vpack.c.bf16 %v756_v42, %v755_v41 }
 0x456   :  { %855 = vmatmul.bf16.vlgmr.msrb.gmra.mxu1 %v771_v48 }
 0x459   :  { %v720_v7 = vpop.f32.mrf.mxu0 }
 0x45a   :  { %v757_v0 = vmul.f32 %v720_v7, %v1896_v10 }
 0x461   :  { %v722_v8 = vpop.f32.mrf.mxu0 }
 0x462   :  { %v758_v23 = vmul.f32 %v722_v8, %v1897_v22 }
 0x464   :  { %v772_v55 = vpack.c.bf16 %v758_v23, %v757_v0 }
 0x466   :  { %860 = vmatmul.bf16.gmra.mxu1 %v772_v55 }
 0x469   :  { %v725_v17 = vpop.f32.mrf.mxu0 }
 0x46a   :  { %v759_v16 = vmul.f32 %v725_v17, %v1898_v52 }
 0x471   :  { %v727_v47 = vpop.f32.mrf.mxu0 }
 0x472   :  { %v760_v25 = vmul.f32 %v727_v47, %v1899_v19 }
 0x474   :  { %v773_v28 = vpack.c.bf16 %v760_v25, %v759_v16 }
 0x476   :  { %865 = vmatmul.bf16.gmra.mxu1 %v773_v28 }
 0x479   :  { %v730_v35 = vpop.f32.mrf.mxu0 }
 0x47a   :  { %v761_v39 = vmul.f32 %v730_v35, %v1900_v27 }
 0x481   :  { %v732_v34 = vpop.f32.mrf.mxu0 }
 0x482   :  { %v762_v43 = vmul.f32 %v732_v34, %v1901_v40 }
 0x484   :  { %v774_v14 = vpack.c.bf16 %v762_v43, %v761_v39 }
 0x486   :  { %870 = vmatmul.bf16.gmra.mxu1 %v774_v14 }
 0x489   :  { %v735_v13 = vpop.f32.mrf.mxu0 }
 0x48a   :  { %v763_v2 = vmul.f32 %v735_v13, %v1640_v21 }
 0x491   :  { %v737_v24 = vpop.f32.mrf.mxu0 }
 0x492   :  { %v764_v3 = vmul.f32 %v737_v24, %v1637_v20 }
 0x494   :  { %v775_v4 = vpack.c.bf16 %v764_v3, %v763_v2 }
 0x496   :  { %875 = vmatmul.bf16.gmra.mxu1 %v775_v4 }
 0x499   :  { %v740_v6 = vpop.f32.mrf.mxu0 }
 0x49a   :  { %v765_v62 = vmul.f32 %v740_v6, %v1646_v32 }
 0x4a1   :  { %v742_v9 = vpop.f32.mrf.mxu0 }
 0x4a2   :  { %v766_v11 = vmul.f32 %v742_v9, %v1643_v26  ;;  %v1234_v26 = vld [vmem:[%s1881_s7] ss:$0 sm:$0xff]  ;;  %s1326_s7 = smov [#allocation2]  }
 0x4a3   :  { %s1076_s1 = sshll.u32 %s1326_s7, 4  ;;  %s1077_s1 = int_to_ptr.vmem [resolvable:$true] %s1076_s1 }
 0x4a4   :  { %v776_v57 = vpack.c.bf16 %v766_v11, %v765_v62 }
 0x4a6   :  { %880 = vmatmul.bf16.gmra.mxu1 %v776_v57 }
 0x4a9   :  { %v745_v60 = vpop.f32.mrf.mxu0 }
 0x4aa   :  { %v767_v12 = vmul.f32 %v745_v60, %v1652_v51 }
 0x4b1   :  { %v747_v5 = vpop.f32.mrf.mxu0 }
 0x4b2   :  { %v768_v58 = vmul.f32 %v747_v5, %v1649_v44 }
 0x4b4   :  { %v777_v54 = vpack.c.bf16 %v768_v58, %v767_v12 }
 0x4b6   :  { %885 = vmatmul.bf16.gmra.mxu1 %v777_v54 }
 0x4b9   :  { %v750_v21 = vpop.f32.mrf.mxu0 }
 0x4ba   :  { %v769_v53 = vmul.f32 %v750_v21, %v1658_v1 }
 0x4c1   :  { %v752_v20 = vpop.f32.mrf.mxu0 }
 0x4c2   :  { %v770_v59 = vmul.f32 %v752_v20, %v1655_v61 }
 0x4c4   :  { %v778_v56 = vpack.c.bf16 %v770_v59, %v769_v53 }
 0x4c6   :  { %890 = vmatmul.bf16.gmra.mxu1 %v778_v56 }
 0x4d3   :  { %v856_v32 = vpop.f32.mrf.mxu1 }
 0x4d4   :  { %v857_v18 = vadd.f32 %v1234_v26, %v856_v32 }
 0x4d6   :  { %896 = vmax.xlane.f32.xlu2 %v857_v18 }
 0x4db   :  { %v858_v51 = vpop.f32.mrf.mxu1 }
 0x4dc   :  { %v859_v49 = vadd.f32 %v1234_v26, %v858_v51 }
 0x4de   :  { %898 = vmax.xlane.f32.xlu0 %v859_v49 }
 0x4e3   :  { %v861_v44 = vpop.f32.mrf.mxu1 }
 0x4e4   :  { %v862_v50 = vadd.f32 %v1234_v26, %v861_v44 }
 0x4e6   :  { %900 = vmax.xlane.f32.xlu1 %v862_v50 }
 0x4eb   :  { %v863_v31 = vpop.f32.mrf.mxu1 }
 0x4ec   :  { %v864_v33 = vadd.f32 %v1234_v26, %v863_v31 }
 0x4ee   :  { %902 = vmax.xlane.f32.xlu2 %v864_v33 }
 0x4f3   :  { %v866_v1 = vpop.f32.mrf.mxu1 }
 0x4f4   :  { %v867_v61 = vadd.f32 %v1234_v26, %v866_v1 }
 0x4f6   :  { %904 = vmax.xlane.f32.xlu2 %v867_v61 }
 0x4fb   :  { %v868_v36 = vpop.f32.mrf.mxu1 }
 0x4fc   :  { %v869_v29 = vadd.f32 %v1234_v26, %v868_v36 }
 0x4fe   :  { %906 = vmax.xlane.f32.xlu0 %v869_v29 }
 0x503   :  { %v871_v30 = vpop.f32.mrf.mxu1 }
 0x504   :  { %v1767_v45 = vadd.f32 %v1234_v26, %v871_v30 }
 0x506   :  { %908 = vmax.xlane.f32.xlu1 %v1767_v45 }
 0x50b   :  { %v873_v63 = vpop.f32.mrf.mxu1 }
 0x50c   :  { %v1770_v46 = vadd.f32 %v1234_v26, %v873_v63 }
 0x50e   :  { %910 = vmax.xlane.f32.xlu2 %v1770_v46 }
 0x513   :  { %v876_v15 = vpop.f32.mrf.mxu1 }
 0x514   :  { %v1773_v37 = vadd.f32 %v1234_v26, %v876_v15 }
 0x516   :  { %912 = vmax.xlane.f32.xlu0 %v1773_v37 }
 0x51b   :  { %v878_v38 = vpop.f32.mrf.mxu1 }
 0x51c   :  { %v1776_v41 = vadd.f32 %v1234_v26, %v878_v38 }
 0x51e   :  { %914 = vmax.xlane.f32.xlu1 %v1776_v41 }
 0x523   :  { %v881_v42 = vpop.f32.mrf.mxu1 }
 0x524   :  { %v1779_v48 = vadd.f32 %v1234_v26, %v881_v42 }
 0x526   :  { %916 = vmax.xlane.f32.xlu2 %v1779_v48 }
 0x52b   :  { %v883_v7 = vpop.f32.mrf.mxu1 }
 0x52c   :  { %v1782_v8 = vadd.f32 %v1234_v26, %v883_v7 }
 0x52e   :  { %918 = vmax.xlane.f32.xlu0 %v1782_v8 }
 0x533   :  { %v886_v10 = vpop.f32.mrf.mxu1 }
 0x534   :  { %v1785_v0 = vadd.f32 %v1234_v26, %v886_v10 }
 0x536   :  { %920 = vmax.xlane.f32.xlu1 %v1785_v0 }
 0x53b   :  { %v888_v22 = vpop.f32.mrf.mxu1 }
 0x53c   :  { %v1788_v23 = vadd.f32 %v1234_v26, %v888_v22 }
 0x53e   :  { %922 = vmax.xlane.f32.xlu2 %v1788_v23 }
 0x543   :  { %v891_v55 = vpop.f32.mrf.mxu1 }
 0x544   :  { %v1791_v17 = vadd.f32 %v1234_v26, %v891_v55 }
 0x546   :  { %924 = vmax.xlane.f32.xlu0 %v1791_v17 }
 0x549   :  { %v897_v47 = vpop.xlane.xlu2 %896 }
 0x54a   :  { %v1794_v52 = vsub.f32 %v857_v18, %v897_v47 }
 0x54b   :  { %v893_v16 = vpop.f32.mrf.mxu1 }
 0x54c   :  { %v944_v19 = vmul.f32 1.442695, %v1794_v52  ;;  %v1797_v25 = vadd.f32 %v1234_v26, %v893_v16 }
 0x54e   :  { %1235 = vpow2.f32 %v944_v19  ;;  %926 = vmax.xlane.f32.xlu1 %v1797_v25 }
 0x551   :  { %v899_v28 = vpop.xlane.xlu0 %898 }
 0x552   :  { %v1800_v35 = vsub.f32 %v859_v49, %v899_v28 }
 0x554   :  { %v1236_v34 = vpop.eup %1235  ;;  %v946_v27 = vmul.f32 1.442695, %v1800_v35 }
 0x555   :  { %976 = vadd.xlane.f32.xlu2 %v1236_v34 }
 0x556   :  { %1237 = vpow2.f32 %v946_v27 }
 0x559   :  { %v901_v39 = vpop.xlane.xlu1 %900 }
 0x55a   :  { %v1803_v40 = vsub.f32 %v862_v50, %v901_v39 }
 0x55c   :  { %v1238_v43 = vpop.eup %1237  ;;  %v948_v14 = vmul.f32 1.442695, %v1803_v40 }
 0x55d   :  { %978 = vadd.xlane.f32.xlu0 %v1238_v43 }
 0x55e   :  { %1239 = vpow2.f32 %v948_v14 }
 0x561   :  { %v903_v13 = vpop.xlane.xlu2 %902 }
 0x562   :  { %v1806_v24 = vsub.f32 %v864_v33, %v903_v13 }
 0x564   :  { %v1240_v2 = vpop.eup %1239  ;;  %v950_v3 = vmul.f32 1.442695, %v1806_v24 }
 0x565   :  { %980 = vadd.xlane.f32.xlu1 %v1240_v2 }
 0x566   :  { %1241 = vpow2.f32 %v950_v3 }
 0x569   :  { %v905_v4 = vpop.xlane.xlu2 %904 }
 0x56a   :  { %v1809_v6 = vsub.f32 %v867_v61, %v905_v4 }
 0x56c   :  { %v1242_v9 = vpop.eup %1241  ;;  %v952_v62 = vmul.f32 1.442695, %v1809_v6 }
 0x56d   :  { %982 = vadd.xlane.f32.xlu2 %v1242_v9 }
 0x56e   :  { %1243 = vpow2.f32 %v952_v62 }
 0x571   :  { %v907_v11 = vpop.xlane.xlu0 %906 }
 0x572   :  { %v1812_v57 = vsub.f32 %v869_v29, %v907_v11 }
 0x574   :  { %v1244_v60 = vpop.eup %1243  ;;  %v954_v5 = vmul.f32 1.442695, %v1812_v57 }
 0x575   :  { %984 = vadd.xlane.f32.xlu0 %v1244_v60 }
 0x576   :  { %1245 = vpow2.f32 %v954_v5 }
 0x579   :  { %v909_v12 = vpop.xlane.xlu1 %908 }
 0x57a   :  { %v1816_v58 = vsub.f32 %v1767_v45, %v909_v12 }
 0x57c   :  { %v1246_v54 = vpop.eup %1245  ;;  %v956_v21 = vmul.f32 1.442695, %v1816_v58 }
 0x57d   :  { %986 = vadd.xlane.f32.xlu1 %v1246_v54 }
 0x57e   :  { %1247 = vpow2.f32 %v956_v21 }
 0x581   :  { %v911_v20 = vpop.xlane.xlu2 %910 }
 0x582   :  { %v1820_v53 = vsub.f32 %v1770_v46, %v911_v20 }
 0x584   :  { %v1248_v59 = vpop.eup %1247  ;;  %v958_v56 = vmul.f32 1.442695, %v1820_v53 }
 0x585   :  { %988 = vadd.xlane.f32.xlu2 %v1248_v59 }
 0x586   :  { %1249 = vpow2.f32 %v958_v56 }
 0x589   :  { %v913_v26 = vpop.xlane.xlu0 %912 }
 0x58a   :  { %v1824_v32 = vsub.f32 %v1773_v37, %v913_v26 }
 0x58c   :  { %v1250_v18 = vpop.eup %1249  ;;  %v960_v51 = vmul.f32 1.442695, %v1824_v32 }
 0x58d   :  { %990 = vadd.xlane.f32.xlu0 %v1250_v18 }
 0x58e   :  { %1251 = vpow2.f32 %v960_v51 }
 0x591   :  { %v915_v49 = vpop.xlane.xlu1 %914 }
 0x592   :  { %v1828_v44 = vsub.f32 %v1776_v41, %v915_v49 }
 0x594   :  { %v1252_v50 = vpop.eup %1251  ;;  %v962_v31 = vmul.f32 1.442695, %v1828_v44 }
 0x595   :  { %992 = vadd.xlane.f32.xlu1 %v1252_v50 }
 0x596   :  { %1253 = vpow2.f32 %v962_v31 }
 0x599   :  { %v917_v33 = vpop.xlane.xlu2 %916 }
 0x59a   :  { %v1832_v1 = vsub.f32 %v1779_v48, %v917_v33 }
 0x59c   :  { %v1254_v61 = vpop.eup %1253  ;;  %v964_v36 = vmul.f32 1.442695, %v1832_v1 }
 0x59d   :  { %994 = vadd.xlane.f32.xlu2 %v1254_v61 }
 0x59e   :  { %1255 = vpow2.f32 %v964_v36 }
 0x5a1   :  { %v919_v29 = vpop.xlane.xlu0 %918 }
 0x5a2   :  { %v1836_v30 = vsub.f32 %v1782_v8, %v919_v29 }
 0x5a4   :  { %v1256_v45 = vpop.eup %1255  ;;  %v966_v63 = vmul.f32 1.442695, %v1836_v30 }
 0x5a5   :  { %996 = vadd.xlane.f32.xlu0 %v1256_v45 }
 0x5a6   :  { %1257 = vpow2.f32 %v966_v63 }
 0x5a9   :  { %v921_v46 = vpop.xlane.xlu1 %920 }
 0x5aa   :  { %v1840_v15 = vsub.f32 %v1785_v0, %v921_v46 }
 0x5ac   :  { %v1258_v37 = vpop.eup %1257  ;;  %v968_v38 = vmul.f32 1.442695, %v1840_v15 }
 0x5ad   :  { %998 = vadd.xlane.f32.xlu1 %v1258_v37 }
 0x5ae   :  { %1259 = vpow2.f32 %v968_v38 }
 0x5b1   :  { %v923_v41 = vpop.xlane.xlu2 %922 }
 0x5b2   :  { %v1844_v42 = vsub.f32 %v1788_v23, %v923_v41 }
 0x5b4   :  { %v1260_v48 = vpop.eup %1259  ;;  %v970_v7 = vmul.f32 1.442695, %v1844_v42 }
 0x5b5   :  { %1000 = vadd.xlane.f32.xlu2 %v1260_v48 }
 0x5b6   :  { %1261 = vpow2.f32 %v970_v7 }
 0x5b9   :  { %v925_v8 = vpop.xlane.xlu0 %924 }
 0x5ba   :  { %v1848_v10 = vsub.f32 %v1791_v17, %v925_v8 }
 0x5bc   :  { %v1262_v0 = vpop.eup %1261  ;;  %v972_v22 = vmul.f32 1.442695, %v1848_v10 }
 0x5bd   :  { %1002 = vadd.xlane.f32.xlu0 %v1262_v0 }
 0x5be   :  { %1263 = vpow2.f32 %v972_v22 }
 0x5c1   :  { %v927_v55 = vpop.xlane.xlu1 %926 }
 0x5c2   :  { %v1852_v47 = vsub.f32 %v1797_v25, %v927_v55 }
 0x5c4   :  { %v1264_v23 = vpop.eup %1263  ;;  %v974_v16 = vmul.f32 1.442695, %v1852_v47 }
 0x5c5   :  { %1004 = vadd.xlane.f32.xlu1 %v1264_v23 }
 0x5c6   :  { %1265 = vpow2.f32 %v974_v16 }
 0x5c8   :  { %v977_v19 = vpop.xlane.xlu2 %976 }
 0x5c9   :  { %1267 = vlog2.f32 %v977_v19 }
 0x5cc   :  { %v1266_v28 = vpop.eup %1265 }
 0x5cd   :  { %1006 = vadd.xlane.f32.xlu2 %v1266_v28 }
 0x5cf   :  { %v1268_v17 = vpop.eup %1267 }
 0x5d0   :  { %v1009_v34 = vmul.f32 0.6931472, %v1268_v17  ;;  %v979_v27 = vpop.xlane.xlu0 %978 }
 0x5d1   :  { %1269 = vlog2.f32 %v979_v27 }
 0x5d2   :  { %v1040_v39 = vsub.f32 %v1794_v52, %v1009_v34 }
 0x5d4   :  { %1056 = vst [vmem:[#allocation2] sm:$0xff] %v1040_v39 }
 0x5d7   :  { %v1270_v43 = vpop.eup %1269 }
 0x5d8   :  { %v1011_v14 = vmul.f32 0.6931472, %v1270_v43  ;;  %v981_v25 = vpop.xlane.xlu1 %980 }
 0x5d9   :  { %1271 = vlog2.f32 %v981_v25 }
 0x5da   :  { %v1041_v13 = vsub.f32 %v1800_v35, %v1011_v14 }
 0x5dc   :  { %1057 = vst [vmem:[#allocation2 + $0x8] sm:$0xff] %v1041_v13 }
 0x5df   :  { %v1272_v2 = vpop.eup %1271 }
 0x5e0   :  { %v1013_v3 = vmul.f32 0.6931472, %v1272_v2  ;;  %v983_v4 = vpop.xlane.xlu2 %982 }
 0x5e1   :  { %1273 = vlog2.f32 %v983_v4 }
 0x5e2   :  { %v1042_v9 = vsub.f32 %v1803_v40, %v1013_v3 }
 0x5e4   :  { %1058 = vst [vmem:[#allocation2 + $0x10] sm:$0xff] %v1042_v9 }
 0x5e7   :  { %v1274_v62 = vpop.eup %1273 }
 0x5e8   :  { %v1015_v11 = vmul.f32 0.6931472, %v1274_v62  ;;  %v985_v60 = vpop.xlane.xlu0 %984 }
 0x5e9   :  { %1275 = vlog2.f32 %v985_v60 }
 0x5ea   :  { %v1043_v52 = vsub.f32 %v1806_v24, %v1015_v11 }
 0x5ec   :  { %1059 = vst [vmem:[#allocation2 + $0x18] sm:$0xff] %v1043_v52 }
 0x5ef   :  { %v1276_v5 = vpop.eup %1275 }
 0x5f0   :  { %v1017_v12 = vmul.f32 0.6931472, %v1276_v5  ;;  %v987_v54 = vpop.xlane.xlu1 %986 }
 0x5f1   :  { %1277 = vlog2.f32 %v987_v54 }
 0x5f2   :  { %v1044_v35 = vsub.f32 %v1809_v6, %v1017_v12 }
 0x5f4   :  { %1060 = vst [vmem:[#allocation2 + $0x20] sm:$0xff] %v1044_v35 }
 0x5f7   :  { %v1278_v21 = vpop.eup %1277 }
 0x5f8   :  { %v1019_v20 = vmul.f32 0.6931472, %v1278_v21  ;;  %v989_v59 = vpop.xlane.xlu2 %988 }
 0x5f9   :  { %1279 = vlog2.f32 %v989_v59 }
 0x5fa   :  { %v1045_v40 = vsub.f32 %v1812_v57, %v1019_v20 }
 0x5fc   :  { %1061 = vst [vmem:[#allocation2 + $0x28] sm:$0xff] %v1045_v40 }
 0x5ff   :  { %v1280_v56 = vpop.eup %1279 }
 0x600   :  { %v1021_v26 = vmul.f32 0.6931472, %v1280_v56  ;;  %v991_v18 = vpop.xlane.xlu0 %990 }
 0x601   :  { %1281 = vlog2.f32 %v991_v18 }
 0x602   :  { %v1046_v24 = vsub.f32 %v1816_v58, %v1021_v26 }
 0x604   :  { %1062 = vst [vmem:[#allocation2 + $0x30] sm:$0xff] %v1046_v24 }
 0x607   :  { %v1282_v51 = vpop.eup %1281 }
 0x608   :  { %v1023_v49 = vmul.f32 0.6931472, %v1282_v51  ;;  %v993_v50 = vpop.xlane.xlu1 %992 }
 0x609   :  { %1283 = vlog2.f32 %v993_v50 }
 0x60a   :  { %v1047_v6 = vsub.f32 %v1820_v53, %v1023_v49 }
 0x60c   :  { %1063 = vst [vmem:[#allocation2 + $0x38] sm:$0xff] %v1047_v6 }
 0x60f   :  { %v1284_v31 = vpop.eup %1283 }
 0x610   :  { %v1025_v33 = vmul.f32 0.6931472, %v1284_v31  ;;  %v995_v61 = vpop.xlane.xlu2 %994 }
 0x611   :  { %1285 = vlog2.f32 %v995_v61 }
 0x612   :  { %v1048_v57 = vsub.f32 %v1824_v32, %v1025_v33 }
 0x614   :  { %1064 = vst [vmem:[#allocation2 + $0x40] sm:$0xff] %v1048_v57 }
 0x617   :  { %v1286_v36 = vpop.eup %1285 }
 0x618   :  { %v1027_v29 = vmul.f32 0.6931472, %v1286_v36  ;;  %v997_v45 = vpop.xlane.xlu0 %996 }
 0x619   :  { %1287 = vlog2.f32 %v997_v45 }
 0x61a   :  { %v1049_v58 = vsub.f32 %v1828_v44, %v1027_v29 }
 0x61c   :  { %1065 = vst [vmem:[#allocation2 + $0x48] sm:$0xff] %v1049_v58 }
 0x61f   :  { %v1288_v63 = vpop.eup %1287 }
 0x620   :  { %v1029_v46 = vmul.f32 0.6931472, %v1288_v63  ;;  %v999_v37 = vpop.xlane.xlu1 %998 }
 0x621   :  { %1289 = vlog2.f32 %v999_v37 }
 0x622   :  { %v1050_v53 = vsub.f32 %v1832_v1, %v1029_v46 }
 0x624   :  { %1066 = vst [vmem:[#allocation2 + $0x50] sm:$0xff] %v1050_v53 }
 0x627   :  { %v1290_v38 = vpop.eup %1289 }
 0x628   :  { %v1031_v41 = vmul.f32 0.6931472, %v1290_v38  ;;  %v1001_v48 = vpop.xlane.xlu2 %1000 }
 0x629   :  { %1291 = vlog2.f32 %v1001_v48 }
 0x62a   :  { %v1051_v32 = vsub.f32 %v1836_v30, %v1031_v41 }
 0x62c   :  { %1067 = vst [vmem:[#allocation2 + $0x58] sm:$0xff] %v1051_v32 }
 0x62f   :  { %v1292_v7 = vpop.eup %1291 }
 0x630   :  { %v1033_v8 = vmul.f32 0.6931472, %v1292_v7  ;;  %v1003_v0 = vpop.xlane.xlu0 %1002 }
 0x631   :  { %1293 = vlog2.f32 %v1003_v0 }
 0x632   :  { %v1052_v44 = vsub.f32 %v1840_v15, %v1033_v8 }
 0x634   :  { %1068 = vst [vmem:[#allocation2 + $0x60] sm:$0xff] %v1052_v44 }
 0x637   :  { %v1294_v22 = vpop.eup %1293 }
 0x638   :  { %v1035_v55 = vmul.f32 0.6931472, %v1294_v22  ;;  %v1005_v23 = vpop.xlane.xlu1 %1004 }
 0x639   :  { %1295 = vlog2.f32 %v1005_v23 }
 0x63a   :  { %v1053_v1 = vsub.f32 %v1844_v42, %v1035_v55 }
 0x63c   :  { %1069 = vst [vmem:[#allocation2 + $0x68] sm:$0xff] %v1053_v1 }
 0x63f   :  { %v1296_v16 = vpop.eup %1295 }
 0x640   :  { %v1037_v19 = vmul.f32 0.6931472, %v1296_v16  ;;  %v1007_v28 = vpop.xlane.xlu2 %1006 }
 0x641   :  { %1297 = vlog2.f32 %v1007_v28 }
 0x642   :  { %v1054_v30 = vsub.f32 %v1848_v10, %v1037_v19 }
 0x644   :  { %1070 = vst [vmem:[#allocation2 + $0x70] sm:$0xff] %v1054_v30 }
 0x647   :  { %v1298_v15 = vpop.eup %1297 }
 0x648   :  { %v1039_v17 = vmul.f32 0.6931472, %v1298_v15 }
 0x64a   :  { %v1055_v42 = vsub.f32 %v1852_v47, %v1039_v17 }
 0x64c   :  { %1071 = vst [vmem:[#allocation2 + $0x78] sm:$0xff] %v1055_v42 }
 0x64d   :  { %1084 = dma.vmem_to_hbm [thread:$0]  %s1077_s1, 2048, %s1079_s29, [#allocation3], %s1327_s30, %s1327_s30, %s1328_s9  }
 0x64e   :  { %1323 = dma.done.wait [#allocation3], 2048  }
 0x64f   :  { %1324 = vsyncadd [#allocation3], 4294965248 }
 0x650   :  { %1089 = vsyncpa [#allocation3], 1 }

</bundles_post_ra>
